<compile_context>
chip_gen: v6e
topology: v6e:2x2x1
jax: 0.10.0
libtpu: 0.0.40
codegen_flags: <defaults>
</compile_context>

<pallas_src>
import jax
import jax.numpy as jnp
from jax.experimental import pallas as pl
from jax.experimental.pallas import tpu as pltpu
import numpy as np


def _round_up(x, m):
    return ((x + m - 1) // m) * m


def _make_layer1_kernel(deg_col, ones_col, eps):
    """SAGE layer 1: aggregate -> W1/b1 -> ReLU -> L2 normalize -> plant ones col."""
    eps2 = eps * eps

    def kernel(a_ref, xs_ref, xd_ref, w_ref, b_ref, out_ref, acc_ref):
        k = pl.program_id(1)

        @pl.when(k == 0)
        def _():
            # Self term (bf16 -> f32, once per row stripe); its ones column makes
            # acc[:, deg_col] end up equal to in_degree + 1.
            acc_ref[...] = xd_ref[...].astype(jnp.float32)

        # bf16 x bf16 -> f32 accumulate: native MXU path, no in-kernel casts.
        acc_ref[...] += jnp.dot(a_ref[...], xs_ref[...],
                                preferred_element_type=jnp.float32)

        @pl.when(k == pl.num_programs(1) - 1)
        def _():
            s = acc_ref[...]
            denom = s[:, deg_col:deg_col + 1]                  # (TM, 1) = in_degree + 1
            h = s * pl.reciprocal(denom, approx=True)          # gcn mean aggregation
            h = jnp.dot(h, w_ref[...],
                        preferred_element_type=jnp.float32) + b_ref[...]
            h = jnp.maximum(h, 0.0)                            # ReLU
            inv = jax.lax.rsqrt(
                jnp.maximum(jnp.sum(h * h, axis=1, keepdims=True), eps2))
            h = h * inv                                        # F.normalize(p=2, dim=1)
            # Plant the ones column used by layer 2's fused degree computation.
            col = jax.lax.broadcasted_iota(jnp.int32, h.shape, 1)
            out_ref[...] = jnp.where(col == ones_col, 1.0, h).astype(out_ref.dtype)

    return kernel


def _make_layer2_kernel(deg_col, eps):
    """SAGE layer 2: aggregate -> W2/b2 -> ReLU -> fc Linear -> PReLU -> L2 normalize."""
    eps2 = eps * eps

    def kernel(a_ref, hs_ref, hd_ref, w_ref, b_ref, wf_ref, bf_ref, pw_ref,
               out_ref, acc_ref):
        k = pl.program_id(1)

        @pl.when(k == 0)
        def _():
            acc_ref[...] = hd_ref[...].astype(jnp.float32)

        acc_ref[...] += jnp.dot(a_ref[...], hs_ref[...],
                                preferred_element_type=jnp.float32)

        @pl.when(k == pl.num_programs(1) - 1)
        def _():
            s = acc_ref[...]
            denom = s[:, deg_col:deg_col + 1]                  # in_degree + 1
            h = s * pl.reciprocal(denom, approx=True)
            h = jnp.dot(h, w_ref[...],
                        preferred_element_type=jnp.float32) + b_ref[...]
            h = jnp.maximum(h, 0.0)                            # sage2 + ReLU
            f = jnp.dot(h, wf_ref[...],
                        preferred_element_type=jnp.float32) + bf_ref[...]
            f = jnp.where(f >= 0.0, f, pw_ref[...] * f)        # PReLU(nhid)
            inv = jax.lax.rsqrt(
                jnp.maximum(jnp.sum(f * f, axis=1, keepdims=True), eps2))
            out_ref[...] = (f * inv).astype(out_ref.dtype)     # F.normalize(dim=1)

    return kernel


def gcn_v_forward(x, adj, w1, b1, w2, b2, wfc, bfc, prelu_w, *,
                  tile_m=256, tile_k=512):
    """Full GCN_V forward (returns fcfeat) as two tiled Pallas kernels.

    x:   (N, F) float32 node features
    adj: (N, N) dense adjacency (A[i, j] = edge j -> i), any float dtype
    w*:  weights pre-transposed to (in, out); b*: (1, out); prelu_w: (1, nhid)

    For very large graphs, tile_k can be raised to 1024/2048 (set
    pltpu.CompilerParams(vmem_limit_bytes=...) if going far past that).
    """
    N, F = x.shape
    H = w1.shape[1]
    eps = 1e-12  # torch F.normalize default

    # Padded, lane-dense sizes; +1 leaves room for the fused-degree "ones" column.
    Fp = _round_up(F + 1, 128)
    Hp = _round_up(H + 1, 128)
    Np = _round_up(N, int(np.lcm(tile_m, tile_k)))

    # Adjacency streamed as bf16 (entries exactly 0/1), consumed directly by the
    # MXU.  NOTE: this materializes a second (Np, Np) copy next to the caller's
    # adjacency; pass a bf16 adjacency from the caller to avoid the duplicate.
    a_p = jnp.zeros((Np, Np), jnp.bfloat16).at[:N, :N].set(adj.astype(jnp.bfloat16))

    # x (bf16) with an appended ones column: A @ [x | 1] + [x | 1] gives both the
    # aggregated features and (in_degree + 1) in a single pass over A.
    xa = jnp.zeros((Np, Fp), jnp.bfloat16)
    xa = xa.at[:N, :F].set(x.astype(jnp.bfloat16))
    xa = xa.at[:, F].set(1.0)

    # Zero-padded f32 weights (padding stays exactly zero through relu/prelu/norm;
    # the finalize matmuls run once per row stripe, so f32 here is essentially free).
    w1p = jnp.zeros((Fp, Hp), jnp.float32).at[:F, :H].set(w1)
    b1p = jnp.zeros((1, Hp), jnp.float32).at[:, :H].set(b1)
    w2p = jnp.zeros((Hp, Hp), jnp.float32).at[:H, :H].set(w2)
    b2p = jnp.zeros((1, Hp), jnp.float32).at[:, :H].set(b2)
    wfp = jnp.zeros((Hp, Hp), jnp.float32).at[:H, :H].set(wfc)
    bfp = jnp.zeros((1, Hp), jnp.float32).at[:, :H].set(bfc)
    pwp = jnp.zeros((1, Hp), jnp.float32).at[:, :H].set(prelu_w)

    grid = (Np // tile_m, Np // tile_k)
    stripes = Np // tile_m
    cparams = pltpu.CompilerParams(
        dimension_semantics=("parallel", "arbitrary"))  # rows shard across TCs (v7x)

    # A tile stream.  TODO(synk): if xprof shows exposed DMA at row-stripe starts
    # (finalize stalling the next prefetch), try pipeline_mode=pl.Buffered(3) here.
    a_spec = pl.BlockSpec((tile_m, tile_k), lambda i, k: (i, k))

    def src_spec(width):
        return pl.BlockSpec((tile_k, width), lambda i, k: (k, 0))

    def dst_spec(width):
        return pl.BlockSpec((tile_m, width), lambda i, k: (i, 0))

    def const_spec(rows, cols):
        return pl.BlockSpec((rows, cols), lambda i, k: (0, 0))

    # ---- pass 1: sage1 + ReLU + normalize ---------------------------------
    cost1 = pl.CostEstimate(
        flops=int(2 * Np * Np * Fp + 2 * Np * Fp * Hp),
        transcendentals=int(2 * Np),
        bytes_accessed=int(Np * Np * 2 + stripes * Np * Fp * 2 + Np * Fp * 2
                           + Np * Hp * 2 + (Fp * Hp + Hp) * 4))
    h1 = pl.pallas_call(
        _make_layer1_kernel(deg_col=F, ones_col=H, eps=eps),
        out_shape=jax.ShapeDtypeStruct((Np, Hp), jnp.bfloat16),
        grid_spec=pltpu.PrefetchScalarGridSpec(
            num_scalar_prefetch=0,
            grid=grid,
            in_specs=[a_spec, src_spec(Fp), dst_spec(Fp),
                      const_spec(Fp, Hp), const_spec(1, Hp)],
            out_specs=dst_spec(Hp),
            scratch_shapes=[pltpu.VMEM((tile_m, Fp), jnp.float32)]),
        compiler_params=cparams,
        cost_estimate=cost1,
    )(a_p, xa, xa, w1p, b1p)

    # ---- pass 2: sage2 + ReLU + fc Linear + PReLU + normalize --------------
    cost2 = pl.CostEstimate(
        flops=int(2 * Np * Np * Hp + 4 * Np * Hp * Hp),
        transcendentals=int(2 * Np),
        bytes_accessed=int(Np * Np * 2 + stripes * Np * Hp * 2 + Np * Hp * 2
                           + Np * Hp * 4 + 2 * (Hp * Hp + Hp) * 4 + Hp * 4))
    f = pl.pallas_call(
        _make_layer2_kernel(deg_col=H, eps=eps),
        out_shape=jax.ShapeDtypeStruct((Np, Hp), jnp.float32),
        grid_spec=pltpu.PrefetchScalarGridSpec(
            num_scalar_prefetch=0,
            grid=grid,
            in_specs=[a_spec, src_spec(Hp), dst_spec(Hp),
                      const_spec(Hp, Hp), const_spec(1, Hp),
                      const_spec(Hp, Hp), const_spec(1, Hp), const_spec(1, Hp)],
            out_specs=dst_spec(Hp),
            scratch_shapes=[pltpu.VMEM((tile_m, Hp), jnp.float32)]),
        compiler_params=cparams,
        cost_estimate=cost2,
    )(a_p, h1, h1, w2p, b2p, wfp, bfp, pwp)

    return f[:N, :H]


def _reference(x, adj, w1, b1, w2, b2, wfc, bfc, prelu_w):
    """Pure-JAX f32 reference of the same forward pass (for a correctness check)."""
    eps = 1e-12
    deg = jnp.sum(adj, axis=1, keepdims=True)
    dinv = 1.0 / (deg + 1.0)

    h = (adj @ x + x) * dinv
    h = jnp.maximum(h @ w1 + b1, 0.0)
    h = h / jnp.maximum(jnp.linalg.norm(h, axis=1, keepdims=True), eps)

    h2 = (adj @ h + h) * dinv
    h2 = jnp.maximum(h2 @ w2 + b2, 0.0)

    f = h2 @ wfc + bfc
    f = jnp.where(f >= 0.0, f, prelu_w * f)
    f = f / jnp.maximum(jnp.linalg.norm(f, axis=1, keepdims=True), eps)
    return f


if __name__ == "__main__":
    # Small, module-consistent shapes (N=384 pads to Np=512 -> grid (2, 1)).
    N = 384           # number of graph nodes
    feature_dim = 32  # input feature dim
    nhid = 32         # hidden dim
    # nclass is unused in the forward path that returns fcfeat.

    key = jax.random.PRNGKey(0)
    k_x, k_a, k_w1, k_b1, k_w2, k_b2, k_wfc, k_bfc = jax.random.split(key, 8)

    # Node features.
    x = jax.random.normal(k_x, (N, feature_dim), dtype=jnp.float32)

    # Deterministic random sparse-ish graph as a dense adjacency (no self loops;
    # the gcn aggregator adds the self term explicitly).
    adj = (jax.random.uniform(k_a, (N, N)) < 0.05).astype(jnp.float32)
    adj = adj * (1.0 - jnp.eye(N, dtype=jnp.float32))

    # Parameters (deterministic synthetic init, torch-Linear-like scaling).
    def lin_init(kw, kb, fan_in, fan_out):
        bound = 1.0 / np.sqrt(fan_in)
        w = jax.random.uniform(kw, (fan_in, fan_out), minval=-bound, maxval=bound,
                               dtype=jnp.float32)           # (in, out) = W^T
        b = jax.random.uniform(kb, (1, fan_out), minval=-bound, maxval=bound,
                               dtype=jnp.float32)
        return w, b

    w1, b1 = lin_init(k_w1, k_b1, feature_dim, nhid)   # sage1.fc_neigh
    w2, b2 = lin_init(k_w2, k_b2, nhid, nhid)          # sage2.fc_neigh
    wfc, bfc = lin_init(k_wfc, k_bfc, nhid, nhid)      # fc[0] Linear
    prelu_w = jnp.full((1, nhid), 0.25, dtype=jnp.float32)  # nn.PReLU(nhid) default

    out = gcn_v_forward(x, adj, w1, b1, w2, b2, wfc, bfc, prelu_w)
    out = jax.block_until_ready(out)

    ref = _reference(x, adj, w1, b1, w2, b2, wfc, bfc, prelu_w)
    # Tolerance relaxed vs the all-f32 version: features / h1 are streamed in bf16
    # (adjacency stays exact 0/1 and accumulation is f32), per the perf review.
    np.testing.assert_allclose(np.asarray(out), np.asarray(ref),
                               rtol=5e-2, atol=5e-3)

    print("KERNEL_OK")
</pallas_src>

<mosaic_0001>
module attributes {stable_mosaic.version = 11 : i64} {
  func.func @kernel(%arg0: i32, %arg1: i32, %arg2: memref<256x512xbf16, #tpu.memory_space<vmem>>, %arg3: memref<512x128xbf16, #tpu.memory_space<vmem>>, %arg4: memref<256x128xbf16, #tpu.memory_space<vmem>>, %arg5: memref<128x128xf32, #tpu.memory_space<vmem>>, %arg6: memref<1x128xf32, #tpu.memory_space<vmem>>, %arg7: memref<256x128xbf16, #tpu.memory_space<vmem>>, %arg8: memref<256x128xf32, #tpu.memory_space<vmem>>) attributes {dimension_semantics = [#tpu.dimension_semantics<parallel>, #tpu.dimension_semantics<arbitrary>], iteration_bounds = array<i64: 2, 1>, scalar_prefetch = 0 : i64, scratch_operands = 1 : i64, tpu.core_type = #tpu.core_type<tc>, window_params = [{transform_indices = @transform_0, window_bounds = array<i64: 256, 512>}, {transform_indices = @transform_1, window_bounds = array<i64: 512, 128>}, {transform_indices = @transform_2, window_bounds = array<i64: 256, 128>}, {pipeline_mode = #tpu.pipeline_mode<synchronous>, transform_indices = @transform_3, window_bounds = array<i64: 128, 128>}, {pipeline_mode = #tpu.pipeline_mode<synchronous>, transform_indices = @transform_4, window_bounds = array<i64: 1, 128>}, {transform_indices = @transform_5, window_bounds = array<i64: 256, 128>}]} {
    %c0_i32 = arith.constant 0 : i32
    %0 = arith.cmpi eq, %arg1, %c0_i32 : i32
    %1 = arith.extui %0 : i1 to i32
    %c0_i32_0 = arith.constant 0 : i32
    %2 = arith.cmpi ne, %1, %c0_i32_0 : i32
    scf.if %2 {
      %c0_10 = arith.constant 0 : index
      %c0_11 = arith.constant 0 : index
      %12 = vector.load %arg4[%c0_10, %c0_11] : memref<256x128xbf16, #tpu.memory_space<vmem>>, vector<256x128xbf16>
      %13 = arith.extf %12 : vector<256x128xbf16> to vector<256x128xf32>
      %c0_12 = arith.constant 0 : index
      %c0_13 = arith.constant 0 : index
      %14 = vector.load %arg8[%c0_12, %c0_13] : memref<256x128xf32, #tpu.memory_space<vmem>>, vector<256x128xf32>
      tpu.vector_store %arg8[%c0_12, %c0_13], %13 {strides = array<i32>} : memref<256x128xf32, #tpu.memory_space<vmem>>, vector<256x128xf32>,
    } else {
    }
    %c0 = arith.constant 0 : index
    %c0_1 = arith.constant 0 : index
    %3 = vector.load %arg8[%c0, %c0_1] : memref<256x128xf32, #tpu.memory_space<vmem>>, vector<256x128xf32>
    %c0_2 = arith.constant 0 : index
    %c0_3 = arith.constant 0 : index
    %4 = vector.load %arg2[%c0_2, %c0_3] : memref<256x512xbf16, #tpu.memory_space<vmem>>, vector<256x512xbf16>
    %c0_4 = arith.constant 0 : index
    %c0_5 = arith.constant 0 : index
    %5 = vector.load %arg3[%c0_4, %c0_5] : memref<512x128xbf16, #tpu.memory_space<vmem>>, vector<512x128xbf16>
    %cst = arith.constant dense<0.000000e+00> : vector<256x128xf32>
    %6 = tpu.matmul %4, %5, %cst {dimension_numbers = #tpu.dot_dimension_numbers<[1], [0], [0], [1], [0, 0, 1, 1], [], []>} : vector<256x512xbf16>, vector<512x128xbf16>, vector<256x128xf32> -> vector<256x128xf32>
    %7 = arith.addf %3, %6 : vector<256x128xf32>
    %c0_6 = arith.constant 0 : index
    %c0_7 = arith.constant 0 : index
    %8 = vector.load %arg8[%c0_6, %c0_7] : memref<256x128xf32, #tpu.memory_space<vmem>>, vector<256x128xf32>
    tpu.vector_store %arg8[%c0_6, %c0_7], %7 {strides = array<i32>} : memref<256x128xf32, #tpu.memory_space<vmem>>, vector<256x128xf32>,
    %c0_i32_8 = arith.constant 0 : i32
    %9 = arith.cmpi eq, %arg1, %c0_i32_8 : i32
    %10 = arith.extui %9 : i1 to i32
    %c0_i32_9 = arith.constant 0 : i32
    %11 = arith.cmpi ne, %10, %c0_i32_9 : i32
    scf.if %11 {
      %c0_10 = arith.constant 0 : index
      %c0_11 = arith.constant 0 : index
      %12 = vector.load %arg8[%c0_10, %c0_11] : memref<256x128xf32, #tpu.memory_space<vmem>>, vector<256x128xf32>
      %13 = vector.extract_strided_slice %12 {offsets = [0, 32], sizes = [256, 1], strides = [1, 1]} : vector<256x128xf32> to vector<256x1xf32>
      %14 = tpu.reciprocal %13 {approx = true} : vector<256x1xf32> -> vector<256x1xf32>
      %15 = vector.broadcast %14 : vector<256x1xf32> to vector<256x128xf32>
      %16 = arith.mulf %12, %15 : vector<256x128xf32>
      %c0_12 = arith.constant 0 : index
      %c0_13 = arith.constant 0 : index
      %17 = vector.load %arg5[%c0_12, %c0_13] : memref<128x128xf32, #tpu.memory_space<vmem>>, vector<128x128xf32>
      %cst_14 = arith.constant dense<0.000000e+00> : vector<256x128xf32>
      %18 = tpu.matmul %16, %17, %cst_14 {dimension_numbers = #tpu.dot_dimension_numbers<[1], [0], [0], [1], [0, 0, 1, 1], [], []>} : vector<256x128xf32>, vector<128x128xf32>, vector<256x128xf32> -> vector<256x128xf32>
      %c0_15 = arith.constant 0 : index
      %c0_16 = arith.constant 0 : index
      %19 = vector.load %arg6[%c0_15, %c0_16] : memref<1x128xf32, #tpu.memory_space<vmem>>, vector<1x128xf32>
      %20 = vector.broadcast %19 : vector<1x128xf32> to vector<256x128xf32>
      %21 = arith.addf %18, %20 : vector<256x128xf32>
      %cst_17 = arith.constant 0.000000e+00 : f32
      %22 = vector.broadcast %cst_17 : f32 to vector<256x128xf32>
      %23 = arith.maximumf %21, %22 : vector<256x128xf32>
      %24 = arith.mulf %23, %23 : vector<256x128xf32>
      %cst_18 = arith.constant dense<0.000000e+00> : vector<256xf32>
      %25 = vector.multi_reduction <add>, %24, %cst_18 [1] : vector<256x128xf32> to vector<256xf32>
      %26 = vector.shape_cast %25 : vector<256xf32> to vector<256x1xf32>
      %cst_19 = arith.constant 1.000000e-24 : f32
      %27 = vector.broadcast %cst_19 : f32 to vector<256x1xf32>
      %28 = arith.maximumf %26, %27 : vector<256x1xf32>
      %29 = math.rsqrt %28 : vector<256x1xf32>
      %30 = vector.broadcast %29 : vector<256x1xf32> to vector<256x128xf32>
      %31 = arith.mulf %23, %30 : vector<256x128xf32>
      %32 = tpu.iota {dimensions = array<i32: 1>} : vector<256x128xi32>
      %c32_i32 = arith.constant 32 : i32
      %33 = vector.broadcast %c32_i32 : i32 to vector<256x128xi32>
      %34 = arith.cmpi eq, %32, %33 : vector<256x128xi32>
      %cst_20 = arith.constant 1.000000e+00 : f32
      %35 = vector.broadcast %cst_20 : f32 to vector<256x128xf32>
      %36 = arith.select %34, %35, %31 : vector<256x128xi1>, vector<256x128xf32>
      %37 = arith.truncf %36 : vector<256x128xf32> to vector<256x128xbf16>
      %c0_21 = arith.constant 0 : index
      %c0_22 = arith.constant 0 : index
      %38 = vector.load %arg7[%c0_21, %c0_22] : memref<256x128xbf16, #tpu.memory_space<vmem>>, vector<256x128xbf16>
      tpu.vector_store %arg7[%c0_21, %c0_22], %37 {strides = array<i32>} : memref<256x128xbf16, #tpu.memory_space<vmem>>, vector<256x128xbf16>,
    } else {
    }
    return
  }
  func.func @transform_0(%arg0: i32, %arg1: i32) -> (i32, i32) {
    %c0_i32 = arith.constant 0 : i32
    return %arg0, %arg1 : i32, i32
  }
  func.func @transform_1(%arg0: i32, %arg1: i32) -> (i32, i32) {
    %c0_i32 = arith.constant 0 : i32
    %c0_i32_0 = arith.constant 0 : i32
    return %arg1, %c0_i32 : i32, i32
  }
  func.func @transform_2(%arg0: i32, %arg1: i32) -> (i32, i32) {
    %c0_i32 = arith.constant 0 : i32
    %c0_i32_0 = arith.constant 0 : i32
    return %arg0, %c0_i32 : i32, i32
  }
  func.func @transform_3(%arg0: i32, %arg1: i32) -> (i32, i32) {
    %c0_i32 = arith.constant 0 : i32
    %c0_i32_0 = arith.constant 0 : i32
    %c0_i32_1 = arith.constant 0 : i32
    return %c0_i32, %c0_i32_0 : i32, i32
  }
  func.func @transform_4(%arg0: i32, %arg1: i32) -> (i32, i32) {
    %c0_i32 = arith.constant 0 : i32
    %c0_i32_0 = arith.constant 0 : i32
    %c0_i32_1 = arith.constant 0 : i32
    return %c0_i32, %c0_i32_0 : i32, i32
  }
  func.func @transform_5(%arg0: i32, %arg1: i32) -> (i32, i32) {
    %c0_i32 = arith.constant 0 : i32
    %c0_i32_0 = arith.constant 0 : i32
    return %arg0, %c0_i32 : i32, i32
  }
}

</mosaic_0001>

<bundles_post_ra>
// kernel: tpu_custom_call.1
= control target key start
LH: loop header
LB: loop body
LE: loop exit
PB: predicated region body
PF: predicated region fallthrough
CT: control target
= control target key end

     0   :  { %s4747_s0 = inlined_call_operand.hbm [shape: bf16[512,512], index: 0, kind: input, shape index: {}]   ;;  %s4748_s1 = inlined_call_operand.hbm [shape: bf16[512,128], index: 1, kind: input, shape index: {}]   ;;  %s4749_s2 = inlined_call_operand.hbm [shape: bf16[512,128], index: 2, kind: input, shape index: {}]   ;;  %s4750_s3 = inlined_call_operand.hbm [shape: f32[128,128], index: 3, kind: input, shape index: {}]   ;;  %s4751_s4 = inlined_call_operand.vmem [shape: f32[1,128], index: 4, kind: input, shape index: {}]   ;;  %s4752_s5 = inlined_call_operand.hbm [shape: bf16[512,128], index: 5, kind: output, shape index: {}]  }
   0x1   :  { %4760 = sst [smem:[#allocation18_spill]] %s4747_s0 }
   0x2   :  { %4761 = sst [smem:[#allocation19_spill]] %s4748_s1 }
   0x3   :  { %10 = vsyncpa [#allocation4], 0 }
   0x4   :  { %12 = vsyncpa [#allocation4 + $0x1], 0 }
   0x5   :  { %13 = vsyncpa [#allocation7], 0 }
   0x6   :  { %14 = vsyncpa [#allocation5], 0 }
   0x7   :  { %16 = vsyncpa [#allocation5 + $0x1], 0  ;;  %s3895_s18 = smov 0   ;;  %s3897_s19 = smov 0  }
   0x8   :  { %s3899_s20 = smov 0   ;;  %s3901_s21 = smov 0  }
   0x9   :  { %s3903_s22 = smov 0   ;;  %s3905_s23 = smov 0  }
   0xa LB: > { %s3926_s24 = sadd.s32 4294967295, %s3849_s23   ;;  %s2564_s25 = sadd.s32 4294967294, %s3849_s23   ;;  %s3849_s23 = sphi %s3905_s23, %s22_s23   ;;  %s3845_s22 = sphi %s3903_s22, %s4789_s22   ;;  %s3841_s21 = sphi %s3901_s21, %s4788_s21   ;;  %s3837_s20 = sphi %s3899_s20, %s4787_s20   ;;  %s3833_s19 = sphi %s3897_s19, %s4786_s19   ;;  %s3829_s18 = sphi %s3895_s18, %s4785_s18  }
   0xb   : > { %p56_p0 = scmp.ne.s32.totalorder %s3833_s19, %s3829_s18  ;;  %p4756_p1 = scmp.eq.s32.totalorder %s3926_s24, 0 }
   0xc   : > { %p180_p3 = scmp.eq.s32.totalorder %s2564_s25, 1  ;;  %p2565_p5 = scmp.ge.s32.totalorder %s3849_s23, 1 }
   0xd   : > { %p3935_p4 = por %p4756_p1, %p56_p0  ;;  %p187_p7 = scmp.lt.s32.totalorder %s3849_s23, 3 }
   0xe   : > { %p3940_p6 = por %p180_p3, %p56_p0  ;;  %s3851_s29 = smov [#allocation6]  }
   0xf   : > { %p3945_p8 = pnand %p2565_p5, %p187_p7  ;;  %s202_s30 = sshll.u32 %s3851_s29, 4  ;;  %s203_s30 = int_to_ptr.vmem [resolvable:$true] %s202_s30 }
  0x10   : > { %s4763_s27 = scalar_select %p3940_p6, 1, 0 }
  0x11   : > { %p3308_p9 = pneg %p3945_p8  ;;  %s34_s7 = sadd.s32 1, %s3845_s22 }
  0x12   : > { %4764 = sst [smem:[#allocation16_spill]] %s4763_s27  ;;  %s3660_s8 = scalar_lea.vmem %s203_s30, 4096 }
  0x13   : > { %p3954_p11 = pnand %p3308_p9, %p4756_p1  ;;  %p3661_p13 = scmp.ne.s32.totalorder %s203_s30, %s3660_s8 }
  0x14   : > { %p3668_p5 = scmp.lt.s32.totalorder %s203_s30, %s203_s30  ;;  %p3669_p7 = scmp.lt.s32.totalorder %s3660_s8, %s3660_s8 }
  0x15   : > { %p4757_p12 = pneg %p3954_p11 }
  0x16   : > { %p3670_p2 = por %p3669_p7, %p3668_p5 }
  0x17   : > { %p3663_p0 = pnand %p3661_p13, %p4757_p12 }
  0x19   : > { %p3664_p3 = pneg %p3663_p0 }
  0x1b   : > { %p3671_p10 = pnand %p3670_p2, %p3664_p3 }
  0x1d   : > { %3674 = shalt.err (!%p3671_p10)
}
  0x1e   : > { %s4753_s9 = smov 64   ;;  %s4754_s10 = smov 4  }
  0x1f   : > { %s4767_s1 = sld [smem:[#allocation19_spill]]  ;;  %p36_p2 = scmp.ge.s32.totalorder %s34_s7, 2 }
  0x20   : > { %s43_s13 = sadd.s32 1, %s3837_s20  ;;  %p50_p9 = scmp.ne.s32.totalorder %s3837_s20, %s3833_s19 }
  0x21   : > { %p51_p10 = scmp.eq.s32.totalorder %s3849_s23, 0  ;;  %s4791_s7 = smov (%p36_p2, %s34_s7), 0 }
  0x22   : > { %4768 = sst [smem:[#allocation17_spill]] %s4791_s7  ;;  %p4770_p0 = scmp.eq.s32.totalorder %s3926_s24, 1 }
  0x23   : > { %p3978_p13 = por %p51_p10, %p50_p9  ;;  %s38_s16 = ssub.s32 %s3845_s22, %s4791_s7 }
  0x24   : > { %p3984_p3 = por %p4770_p0, %p50_p9  ;;  %p3328_p5 = scmp.lt.s32.totalorder %s3849_s23, 2 }
  0x25   : > { %3311 = dma.hbm_to_vmem [thread:$0]  (!%p3954_p11), %s4767_s1, 4096, %s203_s30, [#allocation7], %s4753_s9, %s4753_s9, %s4754_s10  }
  0x26   : > { %p41_p7 = scmp.eq.s32.totalorder %s38_s16, 0  ;;  %s232_s17 = sand.u32 1, %s3849_s23  }
  0x27   : > { %s234_s25 = sand.u32 1, %s3837_s20   ;;  %s2717_s8 = sshll.u32 %s3845_s22, 13 }
  0x28   : > { %s3994_s29 = scalar_select %p41_p7, %s3837_s20, %s43_s13  }
  0x29   : > { %s2569_s30 = sshll.u32 %s234_s25, 9  ;;  %s4772_s0 = sld [smem:[#allocation18_spill]] }
  0x2a   : > { %s236_s10 = scalar_lea.vmem [#allocation3], %s2569_s30  ;;  %p4004_p2 = pnand %p3328_p5, %p3978_p13 }
  0x2b   : > { %s246_s1 = sshll.u32 %s236_s10, 4  ;;  %s4008_s16 = scalar_lea.sflag [#allocation4], %s232_s17  ;;  %s247_s1 = int_to_ptr.vmem [resolvable:$true] %s246_s1 }
  0x2c   : > { %p4759_p9 = pneg %p4004_p2  ;;  %s3688_s13 = scalar_lea.vmem %s247_s1, 8192 }
  0x2d   : > { %p3689_p10 = scmp.ne.s32.totalorder %s247_s1, %s3688_s13  ;;  %s3854_s30 = smov [#allocation3]  }
  0x2e   : > { %s3693_s10 = sshll.u32 %s3854_s30, 4  ;;  %s3694_s10 = int_to_ptr.vmem [resolvable:$false] %s3693_s10 }
  0x2f   : > { %s245_s9 = scalar_lea.hbm %s4772_s0, %s2717_s8  ;;  %p3691_p0 = pnand %p3689_p10, %p4759_p9 }
  0x30   : > { %s3695_s14 = scalar_lea.vmem %s3694_s10, 16384  ;;  %p3696_p13 = scmp.lt.s32.totalorder %s247_s1, %s3694_s10 }
  0x31   : > { %p3692_p7 = pneg %p3691_p0  ;;  %p3697_p5 = scmp.lt.s32.totalorder %s3695_s14, %s3688_s13 }
  0x33   : > { %p3698_p1 = por %p3697_p5, %p3696_p13 }
  0x35   : > { %p3699_p12 = pnand %p3698_p1, %p3692_p7 }
  0x37   : > { %3702 = shalt.err (!%p3699_p12)
}
  0x38   : > { %s3855_s8 = smov 256   ;;  %s3856_s17 = smov 16  }
  0x39   : > { %3318 = dma.hbm_to_vmem [thread:$0]  (!%p4004_p2), %s245_s9, 8192, %s247_s1, %s4008_s16, %s3855_s8, %s3855_s8, %s3856_s17  }
  0x3a   : > { %s2573_s11 = sshll.u32 %s234_s25, 7  ;;  %s3857_s12 = smov [#allocation9]  }
  0x3b   : > { %s215_s0 = sshll.u32 %s3857_s12, 4  ;;  %s260_s30 = scalar_lea.vmem [#allocation8], %s2573_s11  ;;  %s216_s0 = int_to_ptr.vmem [resolvable:$true] %s215_s0 }
  0x3c   : > { %s267_s7 = sshll.u32 %s260_s30, 4  ;;  %s3714_s10 = scalar_lea.vmem %s216_s0, 2048  ;;  %s268_s7 = int_to_ptr.vmem [resolvable:$true] %s267_s7 }
  0x3d   : > { %p3715_p10 = scmp.ne.s32.totalorder %s216_s0, %s3714_s10  ;;  %p4774_p1 = pneg %p3954_p11 }
  0x3e   : > { %p3722_p7 = scmp.lt.s32.totalorder %s216_s0, %s216_s0  ;;  %p3723_p13 = scmp.lt.s32.totalorder %s3714_s10, %s3714_s10 }
  0x3f   : > { %p3717_p12 = pnand %p3715_p10, %p4774_p1 }
  0x40   : > { %p3724_p5 = por %p3723_p13, %p3722_p7 }
  0x41   : > { %p3718_p0 = pneg %p3717_p12 }
  0x43   : > { %p3725_p9 = pnand %p3724_p5, %p3718_p0 }
  0x45   : > { %3728 = shalt.err (!%p3725_p9)
}
  0x46   : > { %s3858_s13 = smov 128   ;;  %s3859_s1 = smov 8  }
  0x47   : > { %3314 = dma.hbm_to_vmem [thread:$0]  (!%p3954_p11), %s4750_s3, 2048, %s216_s0, [#allocation7], %s3858_s13, %s3858_s13, %s3859_s1  }
  0x48   : > { %s2718_s14 = sshll.u32 %s3845_s22, 11  ;;  %s3742_s12 = scalar_lea.vmem %s268_s7, 2048 }
  0x49   : > { %s266_s11 = scalar_lea.hbm %s4749_s2, %s2718_s14  ;;  %p3743_p10 = scmp.ne.s32.totalorder %s268_s7, %s3742_s12 }
  0x4a   : > { %p4775_p9 = pneg %p4004_p2  ;;  %s3860_s30 = smov [#allocation8]  }
  0x4b   : > { %s3747_s10 = sshll.u32 %s3860_s30, 4  ;;  %s3748_s10 = int_to_ptr.vmem [resolvable:$false] %s3747_s10 }
  0x4c   : > { %p3745_p1 = pnand %p3743_p10, %p4775_p9  ;;  %s3749_s6 = scalar_lea.vmem %s3748_s10, 4096 }
  0x4d   : > { %p3750_p0 = scmp.lt.s32.totalorder %s268_s7, %s3748_s10  ;;  %p3751_p7 = scmp.lt.s32.totalorder %s3749_s6, %s3742_s12 }
  0x4e   : > { %p3746_p12 = pneg %p3745_p1 }
  0x4f   : > { %p3752_p13 = por %p3751_p7, %p3750_p0 }
  0x51   : > { %p3753_p11 = pnand %p3752_p13, %p3746_p12 }
  0x53   : > { %3756 = shalt.err (!%p3753_p11)
}
  0x54   : > { %s4776_s0 = smov 4   ;;  %s4777_s13 = smov 64  }
  0x55   : > { %3321 = dma.hbm_to_vmem [thread:$0]  (!%p4004_p2), %s266_s11, 2048, %s268_s7, %s4008_s16, %s4777_s13, %s4777_s13, %s4776_s0  }
  0x56   : > { %279 = sbr.rel (%p3945_p8) target bundleno = 1005 (0x3ed), region = 40  ;;  %s281_s1 = sand.u32 (!%p3945_p8), 1, %s3926_s24  }
  0x57   : > { %s4045_s9 = sand.u32 (!%p3945_p8), 1, %s3833_s19   ;;  %s282_s14 = scalar_lea.sflag (!%p3945_p8), [#allocation4], %s281_s1 }
  0x58   : > { %s2577_s25 = sshll.u32 (!%p3945_p8), %s4045_s9, 9 }
  0x59   : > { %s4048_s8 = scalar_lea.vmem (!%p3945_p8), [#allocation3], %s2577_s25 }
  0x5b   : > { %3808 = dma.done.wait (%p3935_p4), %s282_s14, 8192  }
  0x5c   : > { %3810 = vsyncadd (%p3935_p4), %s282_s14, 4294959104  ;;  %p4778_p2 = scmp.eq.s32.totalorder %s3926_s24, 0 }
  0x5e   : > { %3812 = dma.done.wait (%p4778_p2), [#allocation7], 4096   ;;  %p4779_p8 = pmov %p4778_p2 }
  0x5f   : > { %s2579_s27 = sshll.u32 %s4045_s9, 7 }
  0x60   : > { %3814 = vsyncadd (%p4779_p8), [#allocation7], 4294963200  ;;  %s4061_s28 = scalar_lea.vmem [#allocation8], %s2579_s27 }
  0x61   : > { %3816 = dma.done.wait (%p3935_p4), %s282_s14, 2048  }
  0x62   : > { %3818 = vsyncadd (%p3935_p4), %s282_s14, 4294965248  ;;  %p4780_p5 = pmov %p4778_p2 }
  0x63   : > { %p4781_p10 = pmov %p4778_p2 }
  0x64   : > { %3820 = dma.done.wait (%p4780_p5), [#allocation7], 2048  }
  0x65   : > { %3822 = vsyncadd (%p4781_p10), [#allocation7], 4294965248  ;;  %v3393_v0 = vld [vmem:[#allocation6 + $0x78] sm:$0xff]   ;;  %v3395_v2 = vld [vmem:[#allocation6 + $0x70] sm:$0xff]   ;;  %s4584_s7 = scalar_lea.vmem [#allocation10], %s2579_s27  ;;  %s2751_s16 = sshll.u32 %s3841_s21, 11 }
  0x66   : > { %v3394_v1 = vld [vmem:[#allocation6 + $0x38] sm:$0xff]   ;;  %3278 = vmatprep.subr.bf16.mxu1 %v3393_v0  ;;  %2926 = vmatprep.subr.bf16.mxu0 %v3393_v0  ;;  %v3396_v3 = vld [vmem:[#allocation6 + $0x30] sm:$0xff]   ;;  %v3397_v4 = vld [vmem:[#allocation6 + $0x68] sm:$0xff]   ;;  %s2438_s17 = sshll.u32 %s4584_s7, 4  ;;  %s4696_s30 = scalar_lea.hbm %s4752_s5, %s2751_s16  ;;  %s4698_s17 = int_to_ptr.vmem [resolvable:$true] %s2438_s17 }
  0x67   : > { %3286 = vmatpush3.bf16.msra.mxu1 %v3394_v1  ;;  %2927 = vmatpush3.bf16.msra.mxu0 %v3394_v1  ;;  %v3398_v5 = vld [vmem:[#allocation6 + $0x28] sm:$0xff]   ;;  %v3399_v6 = vld [vmem:[#allocation6 + $0x60] sm:$0xff]   ;;  %v3401_v8 = vld [vmem:[#allocation6 + $0x58] sm:$0xff]   ;;  %s2425_s21 = scalar_lea.sflag [#allocation5], %s4045_s9  ;;  %s3757_s10 = scalar_lea.vmem %s4698_s17, 2048 }
  0x68   : > { %3279 = vmatprep.subr.bf16.mxu1 %v3395_v2  ;;  %2928 = vmatprep.subr.bf16.mxu0 %v3395_v2  ;;  %v3400_v7 = vld [vmem:[#allocation6 + $0x20] sm:$0xff]   ;;  %v3402_v9 = vld [vmem:[#allocation6 + $0x18] sm:$0xff]   ;;  %v3403_v10 = vld [vmem:[#allocation6 + $0x50] sm:$0xff]   ;;  %p3758_p4 = scmp.ne.s32.totalorder %s4698_s17, %s3757_s10  ;;  %s3862_s6 = smov [#allocation10]  }
  0x69   : > { %v3411_v11 = vld [vmem:[%s4048_s8 + $0x184] ss:$16 sps:$4 sm:$0xff]   ;;  %v3405_v13 = vld [vmem:[#allocation6 + $0x48] sm:$0xff]   ;;  %v3412_v17 = vld [vmem:[#allocation6 + $0xf8] sm:$0xff]   ;;  %s3761_s0 = sshll.u32 %s3862_s6, 4  ;;  %s3762_s0 = int_to_ptr.vmem [resolvable:$false] %s3761_s0 }
  0x6a   : > { %v3404_v12 = vld [vmem:[#allocation6 + $0x10] sm:$0xff]   ;;  %1240 = vmatprep.mubr.bf16.mxu1 %v3411_v11  ;;  %v3406_v14 = vld [vmem:[#allocation6 + $0x8] sm:$0xff]   ;;  %v3407_v15 = vld [vmem:[#allocation6 + $0x40] sm:$0xff]   ;;  %p3759_p9 = pnand %p3758_p4, %p3984_p3  ;;  %s3763_s13 = scalar_lea.vmem %s3762_s0, 4096 }
  0x6b   : > { %3287 = vmatpush3.bf16.msra.mxu1 %v3396_v3  ;;  %2929 = vmatpush3.bf16.msra.mxu0 %v3396_v3  ;;  %v3408_v16 = vld [vmem:[#allocation6] sm:$0xff]   ;;  %v3413_v19 = vld [vmem:[#allocation6 + $0xb8] sm:$0xff]   ;;  %v3414_v21 = vld [vmem:[#allocation6 + $0xf0] sm:$0xff]   ;;  %p3764_p12 = scmp.lt.s32.totalorder %s4698_s17, %s3762_s0  ;;  %p3765_p0 = scmp.lt.s32.totalorder %s3763_s13, %s3757_s10 }
  0x6c   : > { %3280 = vmatprep.subr.bf16.mxu1 %v3397_v4  ;;  %2930 = vmatprep.subr.bf16.mxu0 %v3397_v4  ;;  %v3409_v18 = vld [vmem:[%s4048_s8 + $0x180] ss:$16 sps:$4 sm:$0xff]   ;;  %v3416_v20 = vld [vmem:[%s4048_s8 + $0x1a4] ss:$16 sps:$4 sm:$0xff]   ;;  %v3419_v24 = vld [vmem:[#allocation6 + $0xe8] sm:$0xff]   ;;  %p3760_p1 = pneg %p3759_p9 }
  0x6d   : > { %v3415_v22 = vld [vmem:[#allocation6 + $0xb0] sm:$0xff]   ;;  %v3420_v25 = vld [vmem:[#allocation6 + $0xa8] sm:$0xff]   ;;  %v3421_v28 = vld [vmem:[#allocation6 + $0xe0] sm:$0xff]   ;;  %p3766_p7 = por %p3765_p0, %p3764_p12 }
  0x6e   : > { %v3418_v23 = vld [vmem:[%s4048_s8 + $0x1a0] ss:$16 sps:$4 sm:$0xff]   ;;  %v3439_v27 = vld [vmem:[%s4048_s8 + $0x4] ss:$16 sps:$4 sm:$0xff]   ;;  %v3426_v33 = vld [vmem:[#allocation6 + $0xd8] sm:$0xff]  }
  0x6f   : > { %3288 = vmatpush3.bf16.msra.mxu1 %v3398_v5  ;;  %2931 = vmatpush3.bf16.msra.mxu0 %v3398_v5  ;;  %v3437_v26 = vld [vmem:[%s4048_s8] ss:$16 sps:$4 sm:$0xff]   ;;  %v3423_v29 = vld [vmem:[%s4048_s8 + $0x1c4] ss:$16 sps:$4 sm:$0xff]   ;;  %v3427_v36 = vld [vmem:[#allocation6 + $0x98] sm:$0xff]   ;;  %p3767_p13 = pnand %p3766_p7, %p3760_p1 }
  0x70   : > { %3281 = vmatprep.subr.bf16.mxu1 %v3399_v6  ;;  %2932 = vmatprep.subr.bf16.mxu0 %v3399_v6  ;;  %v3443_v30 = vld [vmem:[%s4048_s8 + $0x24] ss:$16 sps:$4 sm:$0xff]   ;;  %v3425_v32 = vld [vmem:[%s4048_s8 + $0x1c0] ss:$16 sps:$4 sm:$0xff]   ;;  %v3433_v41 = vld [vmem:[#allocation6 + $0xc8] sm:$0xff]  }
  0x71   : > { %1144 = vmatprep.mubr.bf16.mxu0 %v3439_v27  ;;  %v3422_v31 = vld [vmem:[#allocation6 + $0xa0] sm:$0xff]   ;;  %v3428_v38 = vld [vmem:[#allocation6 + $0xd0] sm:$0xff]   ;;  %v3434_v44 = vld [vmem:[#allocation6 + $0x88] sm:$0xff]  }
  0x72   : > { %v3447_v34 = vld [vmem:[%s4048_s8 + $0x20] ss:$16 sps:$4 sm:$0xff]   ;;  %v3449_v35 = vld [vmem:[%s4048_s8 + $0x44] ss:$16 sps:$4 sm:$0xff]   ;;  %v3442_v45 = vld [vmem:[%s4048_s8 + $0xc] ss:$16 sps:$4 sm:$0xff]  }
  0x73   : > { %3289 = vmatpush3.bf16.msra.mxu1 %v3400_v7  ;;  %2933 = vmatpush3.bf16.msra.mxu0 %v3400_v7  ;;  %v3430_v37 = vld [vmem:[%s4048_s8 + $0x1e4] ss:$16 sps:$4 sm:$0xff]   ;;  %v3432_v40 = vld [vmem:[%s4048_s8 + $0x1e0] ss:$16 sps:$4 sm:$0xff]   ;;  %v3440_v48 = vld [vmem:[%s4048_s8 + $0x8] ss:$16 sps:$4 sm:$0xff]  }
  0x74   : > { %3282 = vmatprep.subr.bf16.mxu1 %v3401_v8  ;;  %2934 = vmatprep.subr.bf16.mxu0 %v3401_v8  ;;  %v3429_v39 = vld [vmem:[#allocation6 + $0x90] sm:$0xff]   ;;  %v3435_v46 = vld [vmem:[#allocation6 + $0xc0] sm:$0xff]   ;;  %v3445_v51 = vld [vmem:[%s4048_s8 + $0x2c] ss:$16 sps:$4 sm:$0xff]  }
  0x75   : > { %v3453_v42 = vld [vmem:[%s4048_s8 + $0x40] ss:$16 sps:$4 sm:$0xff]   ;;  %v3455_v43 = vld [vmem:[%s4048_s8 + $0x64] ss:$16 sps:$4 sm:$0xff]   ;;  %v3448_v53 = vld [vmem:[%s4048_s8 + $0x28] ss:$16 sps:$4 sm:$0xff]  }
  0x76   : > { %v3436_v47 = vld [vmem:[#allocation6 + $0x80] sm:$0xff]   ;;  %v3451_v55 = vld [vmem:[%s4048_s8 + $0x4c] ss:$16 sps:$4 sm:$0xff]   ;;  %v3454_v57 = vld [vmem:[%s4048_s8 + $0x48] ss:$16 sps:$4 sm:$0xff]  }
  0x77   : > { %3290 = vmatpush3.bf16.msra.mxu1 %v3402_v9  ;;  %2935 = vmatpush3.bf16.msra.mxu0 %v3402_v9  ;;  %v3459_v49 = vld [vmem:[%s4048_s8 + $0x60] ss:$16 sps:$4 sm:$0xff]   ;;  %v3461_v50 = vld [vmem:[%s4048_s8 + $0x84] ss:$16 sps:$4 sm:$0xff]   ;;  %v3457_v59 = vld [vmem:[%s4048_s8 + $0x6c] ss:$16 sps:$4 sm:$0xff]  }
  0x78   : > { %3283 = vmatprep.subr.bf16.mxu1 %v3403_v10  ;;  %2936 = vmatprep.subr.bf16.mxu0 %v3403_v10  ;;  %v3465_v52 = vld [vmem:[%s4048_s8 + $0x80] ss:$16 sps:$4 sm:$0xff]   ;;  %v3467_v54 = vld [vmem:[%s4048_s8 + $0xa4] ss:$16 sps:$4 sm:$0xff]   ;;  %v3460_v61 = vld [vmem:[%s4048_s8 + $0x68] ss:$16 sps:$4 sm:$0xff]  }
  0x79   : > { %v3471_v56 = vld [vmem:[%s4048_s8 + $0xa0] ss:$16 sps:$4 sm:$0xff]   ;;  %v3473_v58 = vld [vmem:[%s4048_s8 + $0xc4] ss:$16 sps:$4 sm:$0xff]   ;;  %v3463_v63 = vld [vmem:[%s4048_s8 + $0x8c] ss:$16 sps:$4 sm:$0xff]  }
  0x7a   : > { %v3477_v60 = vld [vmem:[%s4048_s8 + $0xc0] ss:$16 sps:$4 sm:$0xff]   ;;  %v3479_v62 = vld [vmem:[%s4048_s8 + $0xe4] ss:$16 sps:$4 sm:$0xff]   ;;  %v3466_v1 = vld [vmem:[%s4048_s8 + $0x88] ss:$16 sps:$4 sm:$0xff]  }
  0x7b   : > { %3291 = vmatpush3.bf16.msra.mxu1 %v3404_v12  ;;  %2937 = vmatpush3.bf16.msra.mxu0 %v3404_v12  ;;  %v3483_v0 = vld [vmem:[%s4048_s8 + $0xe0] ss:$16 sps:$4 sm:$0xff]   ;;  %v3485_v2 = vld [vmem:[%s4048_s8 + $0x104] ss:$16 sps:$4 sm:$0xff]   ;;  %v3469_v3 = vld [vmem:[%s4048_s8 + $0xac] ss:$16 sps:$4 sm:$0xff]  }
  0x7c   : > { %3284 = vmatprep.subr.bf16.mxu1 %v3405_v13  ;;  %2938 = vmatprep.subr.bf16.mxu0 %v3405_v13  ;;  %v3489_v4 = vld [vmem:[%s4048_s8 + $0x100] ss:$16 sps:$4 sm:$0xff]   ;;  %v3472_v5 = vld [vmem:[%s4048_s8 + $0xa8] ss:$16 sps:$4 sm:$0xff]   ;;  %v3491_v6 = vld [vmem:[%s4048_s8 + $0x124] ss:$16 sps:$4 sm:$0xff]  }
  0x7d   : > { %v3475_v7 = vld [vmem:[%s4048_s8 + $0xcc] ss:$16 sps:$4 sm:$0xff]   ;;  %v3495_v8 = vld [vmem:[%s4048_s8 + $0x120] ss:$16 sps:$4 sm:$0xff]   ;;  %v3478_v9 = vld [vmem:[%s4048_s8 + $0xc8] ss:$16 sps:$4 sm:$0xff]  }
  0x7e   : > { %v3497_v10 = vld [vmem:[%s4048_s8 + $0x144] ss:$16 sps:$4 sm:$0xff]   ;;  %v3481_v11 = vld [vmem:[%s4048_s8 + $0xec] ss:$16 sps:$4 sm:$0xff]   ;;  %v3501_v12 = vld [vmem:[%s4048_s8 + $0x140] ss:$16 sps:$4 sm:$0xff]  }
  0x7f   : > { %3292 = vmatpush3.bf16.msra.mxu1 %v3406_v14  ;;  %2939 = vmatpush3.bf16.msra.mxu0 %v3406_v14  ;;  %v3484_v13 = vld [vmem:[%s4048_s8 + $0xe8] ss:$16 sps:$4 sm:$0xff]   ;;  %v3503_v14 = vld [vmem:[%s4048_s8 + $0x164] ss:$16 sps:$4 sm:$0xff]   ;;  %v3512_v27 = vld [vmem:[%s4048_s8 + $0x1ac] ss:$16 sps:$4 sm:$0xff]  }
  0x80   : > { %3285 = vmatprep.subr.bf16.mxu1 %v3407_v15  ;;  %2940 = vmatprep.subr.bf16.mxu0 %v3407_v15  ;;  %v3487_v15 = vld [vmem:[%s4048_s8 + $0x10c] ss:$16 sps:$4 sm:$0xff]  }
  0x83   : > { %3293 = vmatpush3.bf16.msra.mxu1 %v3408_v16  ;;  %2941 = vmatpush3.bf16.msra.mxu0 %v3408_v16  ;;  %v3507_v16 = vld [vmem:[%s4048_s8 + $0x160] ss:$16 sps:$4 sm:$0xff]  }
  0x84   : > { %3038 = vmatprep.subr.bf16.mxu1 %v3412_v17  ;;  %v3490_v17 = vld [vmem:[%s4048_s8 + $0x108] ss:$16 sps:$4 sm:$0xff]  }
  0x86   : > { %1241 = vmatmul.mubr.bf16.vlgmr.msra.gmra.mxu1 %v3409_v18  ;;  %1145 = vmatmul.mubr.bf16.vlgmr.msra.gmra.mxu0 %v3437_v26  ;;  %v3493_v18 = vld [vmem:[%s4048_s8 + $0x12c] ss:$16 sps:$4 sm:$0xff]   ;;  %v3511_v26 = vld [vmem:[%s4048_s8 + $0x188] ss:$16 sps:$4 sm:$0xff]  }
  0x87   : > { %3039 = vmatpush3.bf16.msra.mxu1 %v3413_v19  ;;  %1248 = vmatprep.mubr.bf16.mxu1 %v3416_v20  ;;  %v3496_v19 = vld [vmem:[%s4048_s8 + $0x128] ss:$16 sps:$4 sm:$0xff]   ;;  %v3499_v20 = vld [vmem:[%s4048_s8 + $0x14c] ss:$16 sps:$4 sm:$0xff]  }
  0x88   : > { %3040 = vmatprep.subr.bf16.mxu1 %v3414_v21  ;;  %1152 = vmatprep.mubr.bf16.mxu0 %v3443_v30  ;;  %v3502_v21 = vld [vmem:[%s4048_s8 + $0x148] ss:$16 sps:$4 sm:$0xff]  }
  0x89   : > { %v3517_v30 = vld [vmem:[%s4048_s8 + $0x1c8] ss:$16 sps:$4 sm:$0xff]  }
  0x8b   : > { %3041 = vmatpush3.bf16.msra.mxu1 %v3415_v22  ;;  %v3505_v22 = vld [vmem:[%s4048_s8 + $0x16c] ss:$16 sps:$4 sm:$0xff]  }
  0x8c   : > { %3042 = vmatprep.subr.bf16.mxu1 %v3419_v24  ;;  %v3509_v24 = vld [vmem:[%s4048_s8 + $0x18c] ss:$16 sps:$4 sm:$0xff]  }
  0x8e   : > { %1249 = vmatmul.mubr.bf16.gmra.mxu1 %v3418_v23  ;;  %1153 = vmatmul.mubr.bf16.gmra.mxu0 %v3447_v34  ;;  %v3508_v23 = vld [vmem:[%s4048_s8 + $0x168] ss:$16 sps:$4 sm:$0xff]  }
  0x8f   : > { %3043 = vmatpush3.bf16.msra.mxu1 %v3420_v25  ;;  %1256 = vmatprep.mubr.bf16.mxu1 %v3423_v29  ;;  %v3861_v25 = vmov 32   ;;  %v3515_v29 = vld [vmem:[%s4048_s8 + $0x1cc] ss:$16 sps:$4 sm:$0xff]  }
  0x90   : > { %3044 = vmatprep.subr.bf16.mxu1 %v3421_v28  ;;  %1160 = vmatprep.mubr.bf16.mxu0 %v3449_v35  ;;  %v3514_v28 = vld [vmem:[%s4048_s8 + $0x1a8] ss:$16 sps:$4 sm:$0xff]  }
  0x91   : > { %3391 = vset.pattern.permute.xlu0 %v3861_v25  ;;  %3392 = vset.pattern.permute.xlu1 %v3861_v25  ;;  %v1765_v25 = vld [vmem:[#allocation9 + $0x40] sm:$0xff] }
  0x93   : > { %3045 = vmatpush3.bf16.msra.mxu1 %v3422_v31  ;;  %v3518_v31 = vld [vmem:[%s4048_s8 + $0x1ec] ss:$16 sps:$4 sm:$0xff]  }
  0x94   : > { %3046 = vmatprep.subr.bf16.mxu1 %v3426_v33 }
  0x96   : > { %1257 = vmatmul.mubr.bf16.gmra.mxu1 %v3425_v32  ;;  %1161 = vmatmul.mubr.bf16.gmra.mxu0 %v3453_v42  ;;  %v3520_v32 = vld [vmem:[%s4048_s8 + $0x1e8] ss:$16 sps:$4 sm:$0xff]  }
  0x97   : > { %3047 = vmatpush3.bf16.msra.mxu1 %v3427_v36  ;;  %1264 = vmatprep.mubr.bf16.mxu1 %v3430_v37 }
  0x98   : > { %3048 = vmatprep.subr.bf16.mxu1 %v3428_v38  ;;  %1168 = vmatprep.mubr.bf16.mxu0 %v3455_v43 }
  0x9b   : > { %3049 = vmatpush3.bf16.msra.mxu1 %v3429_v39 }
  0x9c   : > { %3050 = vmatprep.subr.bf16.mxu1 %v3433_v41 }
  0x9e   : > { %1265 = vmatmul.mubr.bf16.gmra.mxu1 %v3432_v40  ;;  %1169 = vmatmul.mubr.bf16.gmra.mxu0 %v3459_v49 }
  0x9f   : > { %3051 = vmatpush3.bf16.msra.mxu1 %v3434_v44  ;;  %1305 = vmatprep.mubr.bf16.mxu1 %v3442_v45 }
  0xa0   : > { %3052 = vmatprep.subr.bf16.mxu1 %v3435_v46  ;;  %1176 = vmatprep.mubr.bf16.mxu0 %v3461_v50 }
  0xa3   : > { %3053 = vmatpush3.bf16.msra.mxu1 %v3436_v47 }
  0xa6   : > { %1306 = vmatmul.mubr.bf16.vlgmr.msra.gmra.mxu1 %v3440_v48  ;;  %1177 = vmatmul.mubr.bf16.gmra.mxu0 %v3465_v52 }
  0xa7   : > { %1313 = vmatprep.mubr.bf16.mxu1 %v3445_v51  ;;  %1184 = vmatprep.mubr.bf16.mxu0 %v3467_v54 }
  0xae   : > { %1314 = vmatmul.mubr.bf16.gmra.mxu1 %v3448_v53  ;;  %1185 = vmatmul.mubr.bf16.gmra.mxu0 %v3471_v56 }
  0xaf   : > { %1321 = vmatprep.mubr.bf16.mxu1 %v3451_v55  ;;  %1192 = vmatprep.mubr.bf16.mxu0 %v3473_v58 }
  0xb6   : > { %1322 = vmatmul.mubr.bf16.gmra.mxu1 %v3454_v57  ;;  %1193 = vmatmul.mubr.bf16.gmra.mxu0 %v3477_v60  ;;  %v1772_v57 = vld [vmem:[#allocation9 + $0x78] sm:$0xff] }
  0xb7   : > { %1329 = vmatprep.mubr.bf16.mxu1 %v3457_v59  ;;  %1200 = vmatprep.mubr.bf16.mxu0 %v3479_v62 }
  0xb8   : > { %3198 = vmatprep.subr.mxu0 %v1772_v57 }
  0xb9   : > { %3199 = vmatpush3.msra.mxu0 %v1772_v57 }
  0xbe   : > { %1330 = vmatmul.mubr.bf16.gmra.mxu1 %v3460_v61  ;;  %1201 = vmatmul.mubr.bf16.gmra.mxu0 %v3483_v0  ;;  %v1771_v0 = vld [vmem:[#allocation9 + $0x70] sm:$0xff] }
  0xbf   : > { %1337 = vmatprep.mubr.bf16.mxu1 %v3463_v63  ;;  %1208 = vmatprep.mubr.bf16.mxu0 %v3485_v2 }
  0xc0   : > { %3200 = vmatprep.subr.mxu0 %v1771_v0 }
  0xc1   : > { %3201 = vmatpush3.msra.mxu0 %v1771_v0  ;;  %v1760_v0 = vld [vmem:[#allocation9 + $0x18] sm:$0xff] }
  0xc6   : > { %1338 = vmatmul.mubr.bf16.gmra.mxu1 %v3466_v1  ;;  %1209 = vmatmul.mubr.bf16.gmra.mxu0 %v3489_v4  ;;  %v1770_v4 = vld [vmem:[#allocation9 + $0x68] sm:$0xff] }
  0xc7   : > { %1345 = vmatprep.mubr.bf16.mxu1 %v3469_v3  ;;  %1216 = vmatprep.mubr.bf16.mxu0 %v3491_v6 }
  0xc8   : > { %3202 = vmatprep.subr.mxu0 %v1770_v4 }
  0xc9   : > { %3203 = vmatpush3.msra.mxu0 %v1770_v4  ;;  %v2897_v4 = vld [vmem:[%s4061_s28 + $0x10] sm:$0xff]  }
  0xce   : > { %1346 = vmatmul.mubr.bf16.gmra.mxu1 %v3472_v5  ;;  %1217 = vmatmul.mubr.bf16.gmra.mxu0 %v3495_v8 }
  0xcf   : > { %1353 = vmatprep.mubr.bf16.mxu1 %v3475_v7  ;;  %1224 = vmatprep.mubr.bf16.mxu0 %v3497_v10  ;;  %v1769_v7 = vld [vmem:[#allocation9 + $0x60] sm:$0xff] }
  0xd0   : > { %3204 = vmatprep.subr.mxu0 %v1769_v7 }
  0xd1   : > { %3205 = vmatpush3.msra.mxu0 %v1769_v7 }
  0xd6   : > { %1354 = vmatmul.mubr.bf16.gmra.mxu1 %v3478_v9  ;;  %1225 = vmatmul.mubr.bf16.gmra.mxu0 %v3501_v12  ;;  %v1768_v12 = vld [vmem:[#allocation9 + $0x58] sm:$0xff] }
  0xd7   : > { %1361 = vmatprep.mubr.bf16.mxu1 %v3481_v11  ;;  %1232 = vmatprep.mubr.bf16.mxu0 %v3503_v14  ;;  %v2753_v11 = vld [vmem:[%s4061_s28] sm:$0xff]  }
  0xd8   : > { %3206 = vmatprep.subr.mxu0 %v1768_v12 }
  0xd9   : > { %3207 = vmatpush3.msra.mxu0 %v1768_v12  ;;  %v2762_v12 = vunpack.c.l.bf16 %v2897_v4 }
  0xde   : > { %1362 = vmatmul.mubr.bf16.gmra.mxu1 %v3484_v13  ;;  %1233 = vmatmul.mubr.bf16.gmra.mxu0 %v3507_v16  ;;  %v1767_v16 = vld [vmem:[#allocation9 + $0x50] sm:$0xff] }
  0xdf   : > { %1369 = vmatprep.mubr.bf16.mxu1 %v3487_v15  ;;  %3208 = vmatprep.subr.mxu0 %v1767_v16 }
  0xe0   : > { %3209 = vmatpush3.msra.mxu0 %v1767_v16  ;;  %v1758_v16 = vld [vmem:[#allocation9 + $0x8] sm:$0xff] }
  0xe6   : > { %1370 = vmatmul.mubr.bf16.gmra.mxu1 %v3490_v17  ;;  %v2754_v17 = vunpack.c.l.bf16 %v2753_v11 }
  0xe7   : > { %1377 = vmatprep.mubr.bf16.mxu1 %v3493_v18 }
  0xee   : > { %1378 = vmatmul.mubr.bf16.gmra.mxu1 %v3496_v19 }
  0xef   : > { %1385 = vmatprep.mubr.bf16.mxu1 %v3499_v20 }
  0xf6   : > { %1386 = vmatmul.mubr.bf16.gmra.mxu1 %v3502_v21  ;;  %v1766_v21 = vld [vmem:[#allocation9 + $0x48] sm:$0xff] }
  0xf7   : > { %1393 = vmatprep.mubr.bf16.mxu1 %v3505_v22  ;;  %3210 = vmatprep.subr.mxu0 %v1766_v21 }
  0xf8   : > { %3211 = vmatpush3.msra.mxu0 %v1766_v21 }
  0xf9   : > { %3212 = vmatprep.subr.mxu0 %v1765_v25 }
  0xfa   : > { %3213 = vmatpush3.msra.mxu0 %v1765_v25  ;;  %v2763_v25 = vunpack.c.h.bf16 %v2897_v4 }
  0xfe   : > { %1394 = vmatmul.mubr.bf16.gmra.mxu1 %v3508_v23 }
  0xff   : > { %1401 = vmatprep.mubr.bf16.mxu1 %v3509_v24 }
 0x106   : > { %1402 = vmatmul.mubr.bf16.gmra.mxu1 %v3511_v26 }
 0x107   : > { %1409 = vmatprep.mubr.bf16.mxu1 %v3512_v27 }
 0x10e   : > { %1410 = vmatmul.mubr.bf16.gmra.mxu1 %v3514_v28  ;;  %v2755_v28 = vunpack.c.h.bf16 %v2753_v11 }
 0x10f   : > { %1417 = vmatprep.mubr.bf16.mxu1 %v3515_v29 }
 0x116   : > { %1418 = vmatmul.mubr.bf16.gmra.mxu1 %v3517_v30 }
 0x117   : > { %1425 = vmatprep.mubr.bf16.mxu1 %v3518_v31  ;;  %v1764_v31 = vld [vmem:[#allocation9 + $0x38] sm:$0xff] }
 0x118   : > { %3214 = vmatprep.subr.mxu0 %v1764_v31 }
 0x119   : > { %3215 = vmatpush3.msra.mxu0 %v1764_v31  ;;  %v2898_v31 = vld [vmem:[%s4061_s28 + $0x18] sm:$0xff]  }
 0x11e   : > { %1426 = vmatmul.mubr.bf16.gmra.mxu1 %v3520_v32 }
 0x146   : > { %v3014_v33 = vpop.f32.mrf.mxu1  ;;  %v2942_v39 = vpop.f32.mrf.mxu0 }
 0x148   : > { %v3015_v34 = vpop.f32.mrf.mxu1  ;;  %v2943_v41 = vpop.f32.mrf.mxu0 }
 0x149   : > { %v4135_v35 = vadd.f32 %v3015_v34, %v3014_v33  ;;  %v2944_v13 = vadd.f32 %v2943_v41, %v2942_v39  ;;  %v2896_v33 = vld [vmem:[%s4061_s28 + $0x8] sm:$0xff]   ;;  %v1763_v34 = vld [vmem:[#allocation9 + $0x30] sm:$0xff] }
 0x14a   : > { %v3017_v36 = vpop.f32.mrf.mxu1  ;;  %v2945_v44 = vpop.f32.mrf.mxu0  ;;  %3216 = vmatprep.subr.mxu0 %v1763_v34 }
 0x14b   : > { %3217 = vmatpush3.msra.mxu0 %v1763_v34 }
 0x14c   : > { %v3018_v37 = vpop.f32.mrf.mxu1  ;;  %v2946_v46 = vpop.f32.mrf.mxu0 }
 0x14d   : > { %v4137_v38 = vadd.f32 %v3018_v37, %v3017_v36  ;;  %v2947_v23 = vadd.f32 %v2946_v46, %v2945_v44  ;;  %v1762_v46 = vld [vmem:[#allocation9 + $0x28] sm:$0xff] }
 0x14e   : > { %v3020_v40 = vpop.f32.mrf.mxu1  ;;  %v4143_v49 = vpop.f32.mrf.mxu0  ;;  %3218 = vmatprep.subr.mxu0 %v1762_v46 }
 0x14f   : > { %3219 = vmatpush3.msra.mxu0 %v1762_v46 }
 0x150   : > { %v3021_v42 = vpop.f32.mrf.mxu1  ;;  %v4145_v51 = vpop.f32.mrf.mxu0 }
 0x151   : > { %v4139_v43 = vadd.f32 %v3021_v42, %v3020_v40  ;;  %v2950_v37 = vadd.f32 %v4145_v51, %v4143_v49  ;;  %v2758_v42 = vunpack.c.l.bf16 %v2896_v33 }
 0x152   : > { %v3023_v45 = vpop.f32.mrf.mxu1  ;;  %v4149_v54 = vpop.f32.mrf.mxu0 }
 0x154   : > { %v3024_v47 = vpop.f32.mrf.mxu1  ;;  %v4151_v56 = vpop.f32.mrf.mxu0 }
 0x155   : > { %v4141_v48 = vadd.f32 %v3024_v47, %v3023_v45  ;;  %v2953_v51 = vadd.f32 %v4151_v56, %v4149_v54 }
 0x156   : > { %v3026_v50 = vpop.f32.mrf.mxu1  ;;  %v4155_v60 = vpop.f32.mrf.mxu0 }
 0x158   : > { %v3027_v52 = vpop.f32.mrf.mxu1  ;;  %v4157_v62 = vpop.f32.mrf.mxu0 }
 0x159   : > { %v4147_v53 = vadd.f32 %v3027_v52, %v3026_v50  ;;  %v1761_v50 = vld [vmem:[#allocation9 + $0x20] sm:$0xff]  ;;  %v2956_v54 = vadd.f32 %v4157_v62, %v4155_v60 }
 0x15a   : > { %v3029_v55 = vpop.f32.mrf.mxu1  ;;  %v4161_v2 = vpop.f32.mrf.mxu0  ;;  %3220 = vmatprep.subr.mxu0 %v1761_v50 }
 0x15b   : > { %3221 = vmatpush3.msra.mxu0 %v1761_v50 }
 0x15c   : > { %v3030_v58 = vpop.f32.mrf.mxu1  ;;  %v4163_v5 = vpop.f32.mrf.mxu0  ;;  %3222 = vmatprep.subr.mxu0 %v1760_v0 }
 0x15d   : > { %v4153_v59 = vadd.f32 %v3030_v58, %v3029_v55  ;;  %v2759_v58 = vunpack.c.h.bf16 %v2896_v33  ;;  %3223 = vmatpush3.msra.mxu0 %v1760_v0  ;;  %v2959_v62 = vadd.f32 %v4163_v5, %v4161_v2  ;;  %v2899_v0 = vld [vmem:[%s4061_s28 + $0x20] sm:$0xff]  }
 0x15e   : > { %v3032_v61 = vpop.f32.mrf.mxu1  ;;  %v4167_v9 = vpop.f32.mrf.mxu0 }
 0x160   : > { %v3033_v63 = vpop.f32.mrf.mxu1  ;;  %v4170_v14 = vpop.f32.mrf.mxu0 }
 0x161   : > { %v4159_v1 = vadd.f32 %v3033_v63, %v3032_v61  ;;  %v2962_v5 = vadd.f32 %v4170_v14, %v4167_v9 }
 0x162   : > { %v3035_v3 = vpop.f32.mrf.mxu1  ;;  %v4172_v19 = vpop.f32.mrf.mxu0 }
 0x164   : > { %v3036_v6 = vpop.f32.mrf.mxu1  ;;  %v4174_v24 = vpop.f32.mrf.mxu0 }
 0x165   : > { %v4165_v8 = vadd.f32 %v3036_v6, %v3035_v3 }
 0x166   : > { %v3054_v10 = vpop.f32.mrf.mxu1  ;;  %v4178_v30 = vpop.f32.mrf.mxu0 }
 0x168   : > { %v3055_v15 = vpop.f32.mrf.mxu1  ;;  %v4184_v39 = vpop.f32.mrf.mxu0 }
 0x169   : > { %v3056_v18 = vadd.f32 %v3055_v15, %v3054_v10  ;;  %v1759_v10 = vld [vmem:[#allocation9 + $0x10] sm:$0xff]  ;;  %v2968_v4 = vadd.f32 %v4184_v39, %v4178_v30 }
 0x16a   : > { %v3057_v20 = vpop.f32.mrf.mxu1  ;;  %v4188_v45 = vpop.f32.mrf.mxu0  ;;  %3224 = vmatprep.subr.mxu0 %v1759_v10 }
 0x16b   : > { %v1308_v22 = vadd.f32 %v3056_v18, %v2944_v13  ;;  %3225 = vmatpush3.msra.mxu0 %v1759_v10 }
 0x16c   : > { %v3058_v26 = vpop.f32.mrf.mxu1  ;;  %v4193_v52 = vpop.f32.mrf.mxu0  ;;  %3226 = vmatprep.subr.mxu0 %v1758_v16 }
 0x16d   : > { %v4176_v27 = vadd.f32 %v2754_v17, %v1308_v22  ;;  %v3059_v29 = vadd.f32 %v3058_v26, %v3057_v20  ;;  %3227 = vmatpush3.msra.mxu0 %v1758_v16  ;;  %v1757_v22 = vld [vmem:[#allocation9] sm:$0xff] }
 0x16e   : > { %v3060_v32 = vpop.f32.mrf.mxu1  ;;  %v4197_v63 = vpop.f32.mrf.mxu0  ;;  %3228 = vmatprep.subr.mxu0 %v1757_v22 }
 0x16f   : > { %3521 = vrcp.f32 %v4176_v27  ;;  %v1311_v36 = vadd.f32 %v3059_v29, %v2947_v23  ;;  %3229 = vmatpush3.msra.mxu0 %v1757_v22 }
 0x170   : > { %v3061_v40 = vpop.f32.mrf.mxu1  ;;  %v4203_v56 = vpop.f32.mrf.mxu0 }
 0x171   : > { %v4186_v41 = vadd.f32 %v2755_v28, %v1311_v36  ;;  %v3062_v44 = vadd.f32 %v3061_v40, %v3060_v32 }
 0x172   : > { %v3063_v47 = vpop.f32.mrf.mxu1  ;;  %v4207_v15 = vpop.f32.mrf.mxu0 }
 0x173   : > { %3523 = vrcp.f32 %v4186_v41  ;;  %v1316_v49 = vadd.f32 %v3062_v44, %v2950_v37  ;;  %v2766_v37 = vunpack.c.l.bf16 %v2898_v31 }
 0x174   : > { %v3064_v55 = vpop.f32.mrf.mxu1  ;;  %v4212_v18 = vpop.f32.mrf.mxu0 }
 0x175   : > { %v4195_v57 = vadd.f32 %v2758_v42, %v1316_v49  ;;  %v3065_v61 = vadd.f32 %v3064_v55, %v3063_v47  ;;  %v2965_v47 = vadd.f32 %v4174_v24, %v4172_v19 }
 0x176   : > { %v3066_v3 = vpop.f32.mrf.mxu1  ;;  %v4216_v28 = vpop.f32.mrf.mxu0 }
 0x177   : > { %3525 = vrcp.f32 %v4195_v57  ;;  %v1319_v6 = vadd.f32 %v3065_v61, %v2953_v51  ;;  %v2767_v51 = vunpack.c.h.bf16 %v2898_v31  ;;  %v2974_v31 = vadd.f32 %v4203_v56, %v4197_v63 }
 0x178   : > { %v3067_v7 = vpop.f32.mrf.mxu1  ;;  %v4222_v32 = vpop.f32.mrf.mxu0 }
 0x179   : > { %v4205_v11 = vadd.f32 %v2759_v58, %v1319_v6  ;;  %v3068_v13 = vadd.f32 %v3067_v7, %v3066_v3  ;;  %v2770_v7 = vunpack.c.l.bf16 %v2899_v0 }
 0x17a   : > { %v3069_v17 = vpop.f32.mrf.mxu1  ;;  %v4226_v42 = vpop.f32.mrf.mxu0 }
 0x17b   : > { %3527 = vrcp.f32 %v4205_v11  ;;  %v1324_v60 = vadd.f32 %v3068_v13, %v2956_v54 }
 0x17c   : > { %v3522_v20 = vpop.eup %3521  ;;  %v3070_v21 = vpop.f32.mrf.mxu1 }
 0x17d   : > { %v4214_v23 = vadd.f32 %v2762_v12, %v1324_v60  ;;  %v3071_v26 = vadd.f32 %v3070_v21, %v3069_v17  ;;  %1567 = vperm.xlu0 %3391, %v3522_v20   ;;  %v4231_v9 = vpop.f32.mrf.mxu0  ;;  %v2971_v17 = vadd.f32 %v4193_v52, %v4188_v45  ;;  %v2771_v20 = vunpack.c.h.bf16 %v2899_v0  ;;  %v2901_v0 = vld [vmem:[%s4061_s28 + $0x30] sm:$0xff]  }
 0x17e   : > { %v3072_v29 = vpop.f32.mrf.mxu1 }
 0x17f   : > { %3529 = vrcp.f32 %v4214_v23  ;;  %v1327_v2 = vadd.f32 %v3071_v26, %v2959_v62  ;;  %v4235_v58 = vpop.f32.mrf.mxu0  ;;  %v2900_v26 = vld [vmem:[%s4061_s28 + $0x28] sm:$0xff]  }
 0x180   : > { %v3524_v33 = vpop.eup %3523  ;;  %v3073_v34 = vpop.f32.mrf.mxu1 }
 0x181   : > { %v4224_v36 = vadd.f32 %v2763_v25, %v1327_v2  ;;  %v3074_v40 = vadd.f32 %v3073_v34, %v3072_v29  ;;  %1572 = vperm.xlu0 %3391, %v3524_v33   ;;  %v4241_v19 = vpop.f32.mrf.mxu0  ;;  %v2774_v33 = vunpack.c.l.bf16 %v2900_v26 }
 0x182   : > { %v3075_v44 = vpop.f32.mrf.mxu1 }
 0x183   : > { %3531 = vrcp.f32 %v4224_v36  ;;  %v1332_v46 = vadd.f32 %v3074_v40, %v2962_v5  ;;  %v4245_v12 = vpop.f32.mrf.mxu0 }
 0x184   : > { %v3526_v14 = vpop.eup %3525  ;;  %v3076_v50 = vpop.f32.mrf.mxu1 }
 0x185   : > { %v4233_v49 = vadd.f32 %v2766_v37, %v1332_v46  ;;  %v3077_v55 = vadd.f32 %v3076_v50, %v3075_v44  ;;  %1577 = vperm.xlu1 %3392, %v3526_v14   ;;  %v4250_v30 = vpop.f32.mrf.mxu0  ;;  %v2977_v46 = vadd.f32 %v4212_v18, %v4207_v15  ;;  %v2775_v50 = vunpack.c.h.bf16 %v2900_v26  ;;  %v2902_v26 = vld [vmem:[%s4061_s28 + $0x38] sm:$0xff]  }
 0x186   : > { %v3078_v61 = vpop.f32.mrf.mxu1 }
 0x187   : > { %3533 = vrcp.f32 %v4233_v49  ;;  %v1335_v3 = vadd.f32 %v3077_v55, %v2965_v47  ;;  %v4254_v22 = vpop.f32.mrf.mxu0 }
 0x188   : > { %v3528_v24 = vpop.eup %3527  ;;  %v3079_v6 = vpop.f32.mrf.mxu1 }
 0x189   : > { %v4243_v54 = vadd.f32 %v2767_v51, %v1335_v3  ;;  %v3080_v10 = vadd.f32 %v3079_v6, %v3078_v61  ;;  %1582 = vperm.xlu1 %3392, %v3528_v24   ;;  %v4260_v45 = vpop.f32.mrf.mxu0 }
 0x18a   : > { %v3081_v13 = vpop.f32.mrf.mxu1 }
 0x18b   : > { %3535 = vrcp.f32 %v4243_v54  ;;  %v1340_v16 = vadd.f32 %v3080_v10, %v2968_v4  ;;  %v4264_v37 = vpop.f32.mrf.mxu0  ;;  %v2980_v4 = vadd.f32 %v4222_v32, %v4216_v28 }
 0x18c   : > { %v3530_v39 = vpop.eup %3529  ;;  %v3082_v60 = vpop.f32.mrf.mxu1 }
 0x18d   : > { %v4252_v62 = vadd.f32 %v2770_v7, %v1340_v16  ;;  %v3083_v21 = vadd.f32 %v3082_v60, %v3081_v13  ;;  %1587 = vperm.xlu0 %3391, %v3530_v39   ;;  %v4269_v63 = vpop.f32.mrf.mxu0  ;;  %v2778_v7 = vunpack.c.l.bf16 %v2901_v0 }
 0x18e   : > { %v3084_v25 = vpop.f32.mrf.mxu1 }
 0x18f   : > { %3537 = vrcp.f32 %v4252_v62  ;;  %v1343_v29 = vadd.f32 %v3083_v21, %v2971_v17  ;;  %v4273_v55 = vpop.f32.mrf.mxu0  ;;  %v2983_v17 = vadd.f32 %v4231_v9, %v4226_v42 }
 0x190   : > { %v3532_v52 = vpop.eup %3531  ;;  %v3085_v2 = vpop.f32.mrf.mxu1 }
 0x191   : > { %v4262_v5 = vadd.f32 %v2771_v20, %v1343_v29  ;;  %v3086_v34 = vadd.f32 %v3085_v2, %v3084_v25  ;;  %1592 = vperm.xlu1 %3392, %v3532_v52   ;;  %v4279_v24 = vpop.f32.mrf.mxu0  ;;  %v2779_v20 = vunpack.c.h.bf16 %v2901_v0  ;;  %v2903_v0 = vld [vmem:[%s4061_s28 + $0x40] sm:$0xff]  }
 0x192   : > { %v3087_v40 = vpop.f32.mrf.mxu1 }
 0x193   : > { %3539 = vrcp.f32 %v4262_v5  ;;  %v1348_v44 = vadd.f32 %v3086_v34, %v2974_v31  ;;  %v4286_v28 = vpop.f32.mrf.mxu0  ;;  %v2986_v31 = vadd.f32 %v4241_v19, %v4235_v58  ;;  %v2783_v19 = vunpack.c.h.bf16 %v2902_v26 }
 0x194   : > { %v3534_v56 = vpop.eup %3533  ;;  %v3088_v47 = vpop.f32.mrf.mxu1 }
 0x195   : > { %v4271_v14 = vadd.f32 %v2774_v33, %v1348_v44  ;;  %v3089_v51 = vadd.f32 %v3088_v47, %v3087_v40  ;;  %1597 = vperm.xlu0 %3391, %v3534_v56   ;;  %v3000_v42 = vpop.f32.mrf.mxu0  ;;  %v2782_v33 = vunpack.c.l.bf16 %v2902_v26  ;;  %v2904_v26 = vld [vmem:[%s4061_s28 + $0x48] sm:$0xff]  }
 0x196   : > { %v3090_v61 = vpop.f32.mrf.mxu1 }
 0x197   : > { %3541 = vrcp.f32 %v4271_v14  ;;  %v1351_v3 = vadd.f32 %v3089_v51, %v2977_v46  ;;  %v2989_v46 = vadd.f32 %v4250_v30, %v4245_v12  ;;  %v2786_v30 = vunpack.c.l.bf16 %v2903_v0 }
 0x198   : > { %v3536_v15 = vpop.eup %3535  ;;  %v3091_v18 = vpop.f32.mrf.mxu1 }
 0x199   : > { %v4281_v6 = vadd.f32 %v2775_v50, %v1351_v3  ;;  %v3092_v10 = vadd.f32 %v3091_v18, %v3090_v61  ;;  %1602 = vperm.xlu1 %3392, %v3536_v15   ;;  %v3002_v50 = vpop.f32.mrf.mxu0 }
 0x19a   : > { %v3093_v13 = vpop.f32.mrf.mxu1 }
 0x19b   : > { %3543 = vrcp.f32 %v4281_v6  ;;  %v1356_v16 = vadd.f32 %v3092_v10, %v2980_v4  ;;  %v2992_v4 = vadd.f32 %v4260_v45, %v4254_v22  ;;  %v2787_v45 = vunpack.c.h.bf16 %v2903_v0  ;;  %v2905_v0 = vld [vmem:[%s4061_s28 + $0x50] sm:$0xff]  }
 0x19c   : > { %v3538_v39 = vpop.eup %3537  ;;  %v3094_v60 = vpop.f32.mrf.mxu1 }
 0x19d   : > { %v4288_v32 = vadd.f32 %v2778_v7, %v1356_v16  ;;  %v3095_v21 = vadd.f32 %v3094_v60, %v3093_v13  ;;  %1607 = vperm.xlu0 %3391, %v3538_v39   ;;  %v3003_v7 = vpop.f32.mrf.mxu0 }
 0x19e   : > { %v3096_v25 = vpop.f32.mrf.mxu1 }
 0x19f   : > { %3545 = vrcp.f32 %v4288_v32  ;;  %v1359_v29 = vadd.f32 %v3095_v21, %v2983_v17  ;;  %v2995_v17 = vadd.f32 %v4269_v63, %v4264_v37  ;;  %v2790_v63 = vunpack.c.l.bf16 %v2904_v26 }
 0x1a0   : > { %v3540_v52 = vpop.eup %3539  ;;  %v3097_v2 = vpop.f32.mrf.mxu1 }
 0x1a1   : > { %v4294_v9 = vadd.f32 %v2779_v20, %v1359_v29  ;;  %v3098_v34 = vadd.f32 %v3097_v2, %v3096_v25  ;;  %1612 = vperm.xlu1 %3392, %v3540_v52   ;;  %v3005_v20 = vpop.f32.mrf.mxu0 }
 0x1a2   : > { %v3099_v40 = vpop.f32.mrf.mxu1 }
 0x1a3   : > { %3547 = vrcp.f32 %v4294_v9  ;;  %v1364_v44 = vadd.f32 %v3098_v34, %v2986_v31  ;;  %v2998_v31 = vadd.f32 %v4279_v24, %v4273_v55  ;;  %v2791_v55 = vunpack.c.h.bf16 %v2904_v26  ;;  %v2906_v26 = vld [vmem:[%s4061_s28 + $0x58] sm:$0xff]  }
 0x1a4   : > { %v3542_v56 = vpop.eup %3541  ;;  %v3100_v47 = vpop.f32.mrf.mxu1 }
 0x1a5   : > { %v4299_v58 = vadd.f32 %v2782_v33, %v1364_v44  ;;  %v3101_v51 = vadd.f32 %v3100_v47, %v3099_v40  ;;  %1617 = vperm.xlu0 %3391, %v3542_v56   ;;  %v3006_v33 = vpop.f32.mrf.mxu0 }
 0x1a6   : > { %v3102_v61 = vpop.f32.mrf.mxu1 }
 0x1a7   : > { %3549 = vrcp.f32 %v4299_v58  ;;  %v1367_v3 = vadd.f32 %v3101_v51, %v2989_v46  ;;  %v3001_v46 = vadd.f32 %v3000_v42, %v4286_v28  ;;  %v2794_v28 = vunpack.c.l.bf16 %v2905_v0 }
 0x1a8   : > { %v3544_v15 = vpop.eup %3543  ;;  %v3103_v18 = vpop.f32.mrf.mxu1 }
 0x1a9   : > { %v4305_v12 = vadd.f32 %v2783_v19, %v1367_v3  ;;  %v3104_v10 = vadd.f32 %v3103_v18, %v3102_v61  ;;  %1622 = vperm.xlu1 %3392, %v3544_v15   ;;  %v3008_v19 = vpop.f32.mrf.mxu0 }
 0x1aa   : > { %v3105_v13 = vpop.f32.mrf.mxu1 }
 0x1ab   : > { %3551 = vrcp.f32 %v4305_v12  ;;  %v1372_v16 = vadd.f32 %v3104_v10, %v2992_v4  ;;  %v3004_v4 = vadd.f32 %v3003_v7, %v3002_v50  ;;  %v2795_v50 = vunpack.c.h.bf16 %v2905_v0  ;;  %v2907_v0 = vld [vmem:[%s4061_s28 + $0x60] sm:$0xff]  }
 0x1ac   : > { %v3546_v39 = vpop.eup %3545  ;;  %v3106_v60 = vpop.f32.mrf.mxu1 }
 0x1ad   : > { %v4310_v22 = vadd.f32 %v2786_v30, %v1372_v16  ;;  %v3107_v21 = vadd.f32 %v3106_v60, %v3105_v13  ;;  %1627 = vperm.xlu0 %3391, %v3546_v39   ;;  %v3009_v30 = vpop.f32.mrf.mxu0 }
 0x1ae   : > { %v3108_v25 = vpop.f32.mrf.mxu1 }
 0x1af   : > { %3553 = vrcp.f32 %v4310_v22  ;;  %v1375_v29 = vadd.f32 %v3107_v21, %v2995_v17  ;;  %v3007_v17 = vadd.f32 %v3006_v33, %v3005_v20  ;;  %v2798_v20 = vunpack.c.l.bf16 %v2906_v26 }
 0x1b0   : > { %v3548_v52 = vpop.eup %3547  ;;  %v3109_v2 = vpop.f32.mrf.mxu1 }
 0x1b1   : > { %v4316_v37 = vadd.f32 %v2787_v45, %v1375_v29  ;;  %v3110_v34 = vadd.f32 %v3109_v2, %v3108_v25  ;;  %1632 = vperm.xlu1 %3392, %v3548_v52   ;;  %v3011_v45 = vpop.f32.mrf.mxu0 }
 0x1b2   : > { %v3111_v40 = vpop.f32.mrf.mxu1 }
 0x1b3   : > { %3555 = vrcp.f32 %v4316_v37  ;;  %v1380_v44 = vadd.f32 %v3110_v34, %v2998_v31  ;;  %v3010_v31 = vadd.f32 %v3009_v30, %v3008_v19  ;;  %v2802_v30 = vunpack.c.l.bf16 %v2907_v0 }
 0x1b4   : > { %v3550_v56 = vpop.eup %3549  ;;  %v3112_v47 = vpop.f32.mrf.mxu1 }
 0x1b5   : > { %v4320_v51 = vadd.f32 %v2790_v63, %v1380_v44  ;;  %v3113_v24 = vadd.f32 %v3112_v47, %v3111_v40  ;;  %1637 = vperm.xlu0 %3391, %v3550_v56   ;;  %v3012_v63 = vpop.f32.mrf.mxu0 }
 0x1b6   : > { %v3114_v61 = vpop.f32.mrf.mxu1 }
 0x1b7   : > { %3557 = vrcp.f32 %v4320_v51  ;;  %v1383_v3 = vadd.f32 %v3113_v24, %v3001_v46  ;;  %v3013_v46 = vadd.f32 %v3012_v63, %v3011_v45  ;;  %v2799_v24 = vunpack.c.h.bf16 %v2906_v26 }
 0x1b8   : > { %v3552_v15 = vpop.eup %3551  ;;  %v3115_v18 = vpop.f32.mrf.mxu1 }
 0x1b9   : > { %v4324_v10 = vadd.f32 %v2791_v55, %v1383_v3  ;;  %v3116_v42 = vadd.f32 %v3115_v18, %v3114_v61  ;;  %1642 = vperm.xlu1 %3392, %v3552_v15  }
 0x1ba   : > { %v3117_v13 = vpop.f32.mrf.mxu1 }
 0x1bb   : > { %3559 = vrcp.f32 %v4324_v10  ;;  %v1388_v16 = vadd.f32 %v3116_v42, %v3004_v4 }
 0x1bc   : > { %v3554_v39 = vpop.eup %3553  ;;  %v3118_v60 = vpop.f32.mrf.mxu1 }
 0x1bd   : > { %v4327_v21 = vadd.f32 %v2794_v28, %v1388_v16  ;;  %v3119_v7 = vadd.f32 %v3118_v60, %v3117_v13  ;;  %1647 = vperm.xlu0 %3391, %v3554_v39   ;;  %v2803_v60 = vunpack.c.h.bf16 %v2907_v0 }
 0x1be   : > { %v3120_v25 = vpop.f32.mrf.mxu1 }
 0x1bf   : > { %3561 = vrcp.f32 %v4327_v21  ;;  %v1391_v29 = vadd.f32 %v3119_v7, %v3007_v17  ;;  %v2908_v7 = vld [vmem:[%s4061_s28 + $0x68] sm:$0xff]  }
 0x1c0   : > { %v3556_v52 = vpop.eup %3555  ;;  %v3121_v2 = vpop.f32.mrf.mxu1 }
 0x1c1   : > { %v4331_v34 = vadd.f32 %v2795_v50, %v1391_v29  ;;  %v3122_v33 = vadd.f32 %v3121_v2, %v3120_v25  ;;  %1652 = vperm.xlu1 %3392, %v3556_v52   ;;  %v2806_v52 = vunpack.c.l.bf16 %v2908_v7 }
 0x1c2   : > { %v3123_v40 = vpop.f32.mrf.mxu1 }
 0x1c3   : > { %3563 = vrcp.f32 %v4331_v34  ;;  %v1396_v44 = vadd.f32 %v3122_v33, %v3010_v31 }
 0x1c4   : > { %v3558_v56 = vpop.eup %3557  ;;  %v3124_v47 = vpop.f32.mrf.mxu1 }
 0x1c5   : > { %v4334_v55 = vadd.f32 %v2798_v20, %v1396_v44  ;;  %v3125_v19 = vadd.f32 %v3124_v47, %v3123_v40  ;;  %1657 = vperm.xlu0 %3391, %v3558_v56   ;;  %v2807_v44 = vunpack.c.h.bf16 %v2908_v7  ;;  %v2909_v56 = vld [vmem:[%s4061_s28 + $0x70] sm:$0xff]  }
 0x1c6   : > { %v3126_v61 = vpop.f32.mrf.mxu1  ;;  %v2810_v0 = vunpack.c.l.bf16 %v2909_v56 }
 0x1c7   : > { %3565 = vrcp.f32 %v4334_v55  ;;  %v1399_v3 = vadd.f32 %v3125_v19, %v3013_v46 }
 0x1c8   : > { %v3560_v4 = vpop.eup %3559  ;;  %v3127_v15 = vpop.f32.mrf.mxu1 }
 0x1c9   : > { %v4338_v18 = vadd.f32 %v2799_v24, %v1399_v3  ;;  %v3128_v28 = vadd.f32 %v3127_v15, %v3126_v61  ;;  %1662 = vperm.xlu1 %3392, %v3560_v4  }
 0x1ca   : > { %v3129_v42 = vpop.f32.mrf.mxu1 }
 0x1cb   : > { %3567 = vrcp.f32 %v4338_v18  ;;  %v1404_v13 = vadd.f32 %v3128_v28, %v4135_v35 }
 0x1cc   : > { %v3562_v16 = vpop.eup %3561  ;;  %v3130_v17 = vpop.f32.mrf.mxu1 }
 0x1cd   : > { %v4342_v39 = vadd.f32 %v2802_v30, %v1404_v13  ;;  %v3131_v45 = vadd.f32 %v3130_v17, %v3129_v42  ;;  %1667 = vperm.xlu0 %3391, %v3562_v16   ;;  %v2811_v42 = vunpack.c.h.bf16 %v2909_v56  ;;  %v2910_v16 = vld [vmem:[%s4061_s28 + $0x78] sm:$0xff]  }
 0x1ce   : > { %v3132_v50 = vpop.f32.mrf.mxu1  ;;  %v2814_v7 = vunpack.c.l.bf16 %v2910_v16 }
 0x1cf   : > { %3569 = vrcp.f32 %v4342_v39  ;;  %v1407_v25 = vadd.f32 %v3131_v45, %v4137_v38 }
 0x1d0   : > { %v3564_v26 = vpop.eup %3563  ;;  %v3133_v29 = vpop.f32.mrf.mxu1 }
 0x1d1   : > { %v4347_v31 = vadd.f32 %v2803_v60, %v1407_v25  ;;  %v3134_v35 = vadd.f32 %v3133_v29, %v3132_v50  ;;  %1672 = vperm.xlu1 %3392, %v3564_v26  }
 0x1d2   : > { %v3135_v2 = vpop.f32.mrf.mxu1 }
 0x1d3   : > { %3571 = vrcp.f32 %v4347_v31  ;;  %v1412_v63 = vadd.f32 %v3134_v35, %v4139_v43 }
 0x1d4   : > { %v3566_v20 = vpop.eup %3565  ;;  %v3136_v33 = vpop.f32.mrf.mxu1 }
 0x1d5   : > { %v4351_v40 = vadd.f32 %v2806_v52, %v1412_v63  ;;  %v3137_v46 = vadd.f32 %v3136_v33, %v3135_v2  ;;  %1677 = vperm.xlu0 %3391, %v3566_v20   ;;  %v2815_v2 = vunpack.c.h.bf16 %v2910_v16 }
 0x1d6   : > { %v3138_v38 = vpop.f32.mrf.mxu1 }
 0x1d7   : > { %3573 = vrcp.f32 %v4351_v40  ;;  %v1415_v47 = vadd.f32 %v3137_v46, %v4141_v48 }
 0x1d8   : > { %v3568_v24 = vpop.eup %3567  ;;  %v3139_v19 = vpop.f32.mrf.mxu1 }
 0x1d9   : > { %v4356_v61 = vadd.f32 %v2807_v44, %v1415_v47  ;;  %v3140_v43 = vadd.f32 %v3139_v19, %v3138_v38  ;;  %1682 = vperm.xlu1 %3392, %v3568_v24  }
 0x1da   : > { %v3141_v3 = vpop.f32.mrf.mxu1 }
 0x1db   : > { %3575 = vrcp.f32 %v4356_v61  ;;  %v1420_v4 = vadd.f32 %v3140_v43, %v4147_v53 }
 0x1dc   : > { %v3570_v15 = vpop.eup %3569  ;;  %v3142_v30 = vpop.f32.mrf.mxu1 }
 0x1dd   : > { %v4360_v28 = vadd.f32 %v2810_v0, %v1420_v4  ;;  %v3143_v13 = vadd.f32 %v3142_v30, %v3141_v3  ;;  %1687 = vperm.xlu0 %3391, %v3570_v15  }
 0x1de   : > { %v3144_v48 = vpop.f32.mrf.mxu1 }
 0x1df   : > { %3577 = vrcp.f32 %v4360_v28  ;;  %v1423_v17 = vadd.f32 %v3143_v13, %v4153_v59 }
 0x1e0   : > { %v3572_v60 = vpop.eup %3571  ;;  %v3145_v45 = vpop.f32.mrf.mxu1 }
 0x1e1   : > { %v4365_v50 = vadd.f32 %v2811_v42, %v1423_v17  ;;  %v3146_v25 = vadd.f32 %v3145_v45, %v3144_v48  ;;  %1692 = vperm.xlu1 %3392, %v3572_v60  }
 0x1e2   : > { %v3147_v53 = vpop.f32.mrf.mxu1 }
 0x1e3   : > { %3579 = vrcp.f32 %v4365_v50  ;;  %v1428_v26 = vadd.f32 %v3146_v25, %v4159_v1 }
 0x1e4   : > { %v3574_v29 = vpop.eup %3573  ;;  %v3148_v52 = vpop.f32.mrf.mxu1 }
 0x1e5   : > { %v4369_v35 = vadd.f32 %v2814_v7, %v1428_v26  ;;  %v3149_v63 = vadd.f32 %v3148_v52, %v3147_v53  ;;  %1697 = vperm.xlu0 %3391, %v3574_v29  }
 0x1e7   : > { %3581 = vrcp.f32 %v4369_v35  ;;  %v1431_v59 = vadd.f32 %v3149_v63, %v4165_v8 }
 0x1e8   : > { %v3576_v20 = vpop.eup %3575 }
 0x1e9   : > { %v4373_v33 = vadd.f32 %v2815_v2, %v1431_v59  ;;  %1702 = vperm.xlu1 %3392, %v3576_v20  }
 0x1eb   : > { %3583 = vrcp.f32 %v4373_v33 }
 0x1ec   : > { %v3578_v44 = vpop.eup %3577 }
 0x1ed   : > { %1707 = vperm.xlu0 %3391, %v3578_v44  }
 0x1f0   : > { %v3580_v1 = vpop.eup %3579 }
 0x1f1   : > { %1712 = vperm.xlu1 %3392, %v3580_v1  }
 0x1f4   : > { %v3582_v46 = vpop.eup %3581 }
 0x1f5   : > { %1717 = vperm.xlu0 %3391, %v3582_v46  }
 0x1f8   : > { %v3584_v38 = vpop.eup %3583  ;;  %v1568_v56 = vpop.permute.xlu0 %1567 }
 0x1f9   : > { %v1725_v47 = vmul.f32 %v1568_v56, %v4176_v27  ;;  %1722 = vperm.xlu1 %3392, %v3584_v38  }
 0x1fb   : > { %3230 = vmatprep.mubr.f32.mxu0 %v1725_v47 }
 0x1fc   : > { %v1573_v24 = vpop.permute.xlu0 %1572 }
 0x1fd   : > { %v1726_v8 = vmul.f32 %v1573_v24, %v4186_v41 }
 0x1ff   : > { %3231 = vmatmul.mubr.f32.vlgmr.msra.gmra.mxu0 %v1726_v8 }
 0x200   : > { %v1578_v19 = vpop.permute.xlu1 %1577 }
 0x201   : > { %v1727_v0 = vmul.f32 %v1578_v19, %v4195_v57 }
 0x203   : > { %3233 = vmatprep.mubr.f32.mxu0 %v1727_v0 }
 0x204   : > { %v1583_v43 = vpop.permute.xlu1 %1582 }
 0x205   : > { %v1728_v3 = vmul.f32 %v1583_v43, %v4205_v11 }
 0x207   : > { %3234 = vmatmul.mubr.f32.gmra.mxu0 %v1728_v3 }
 0x208   : > { %v1588_v4 = vpop.permute.xlu0 %1587 }
 0x209   : > { %v1729_v15 = vmul.f32 %v1588_v4, %v4214_v23 }
 0x20b   : > { %3236 = vmatprep.mubr.f32.mxu0 %v1729_v15 }
 0x20c   : > { %v1593_v30 = vpop.permute.xlu1 %1592 }
 0x20d   : > { %v1730_v27 = vmul.f32 %v1593_v30, %v4224_v36 }
 0x20f   : > { %3237 = vmatmul.mubr.f32.gmra.mxu0 %v1730_v27 }
 0x210   : > { %v1598_v42 = vpop.permute.xlu0 %1597 }
 0x211   : > { %v1731_v41 = vmul.f32 %v1598_v42, %v4233_v49 }
 0x213   : > { %3239 = vmatprep.mubr.f32.mxu0 %v1731_v41 }
 0x214   : > { %v1603_v13 = vpop.permute.xlu1 %1602 }
 0x215   : > { %v1732_v57 = vmul.f32 %v1603_v13, %v4243_v54 }
 0x217   : > { %3240 = vmatmul.mubr.f32.gmra.mxu0 %v1732_v57 }
 0x218   : > { %v1608_v48 = vpop.permute.xlu0 %1607 }
 0x219   : > { %v1733_v11 = vmul.f32 %v1608_v48, %v4252_v62 }
 0x21b   : > { %3242 = vmatprep.mubr.f32.mxu0 %v1733_v11 }
 0x21c   : > { %v1613_v16 = vpop.permute.xlu1 %1612 }
 0x21d   : > { %v1734_v23 = vmul.f32 %v1613_v16, %v4262_v5 }
 0x21f   : > { %3243 = vmatmul.mubr.f32.gmra.mxu0 %v1734_v23 }
 0x220   : > { %v1618_v17 = vpop.permute.xlu0 %1617 }
 0x221   : > { %v1735_v36 = vmul.f32 %v1618_v17, %v4271_v14 }
 0x223   : > { %3245 = vmatprep.mubr.f32.mxu0 %v1735_v36 }
 0x224   : > { %v1623_v60 = vpop.permute.xlu1 %1622 }
 0x225   : > { %v1736_v49 = vmul.f32 %v1623_v60, %v4281_v6 }
 0x227   : > { %3246 = vmatmul.mubr.f32.gmra.mxu0 %v1736_v49 }
 0x228   : > { %v1628_v45 = vpop.permute.xlu0 %1627 }
 0x229   : > { %v1737_v54 = vmul.f32 %v1628_v45, %v4288_v32 }
 0x22b   : > { %3248 = vmatprep.mubr.f32.mxu0 %v1737_v54 }
 0x22c   : > { %v1633_v7 = vpop.permute.xlu1 %1632 }
 0x22d   : > { %v1738_v62 = vmul.f32 %v1633_v7, %v4294_v9 }
 0x22f   : > { %3249 = vmatmul.mubr.f32.gmra.mxu0 %v1738_v62 }
 0x230   : > { %v1638_v25 = vpop.permute.xlu0 %1637 }
 0x231   : > { %v1739_v5 = vmul.f32 %v1638_v25, %v4299_v58 }
 0x233   : > { %3251 = vmatprep.mubr.f32.mxu0 %v1739_v5 }
 0x234   : > { %v1643_v53 = vpop.permute.xlu1 %1642 }
 0x235   : > { %v1740_v14 = vmul.f32 %v1643_v53, %v4305_v12 }
 0x237   : > { %3252 = vmatmul.mubr.f32.gmra.mxu0 %v1740_v14 }
 0x238   : > { %v1648_v26 = vpop.permute.xlu0 %1647 }
 0x239   : > { %v1741_v6 = vmul.f32 %v1648_v26, %v4310_v22 }
 0x23b   : > { %3254 = vmatprep.mubr.f32.mxu0 %v1741_v6 }
 0x23c   : > { %v1653_v29 = vpop.permute.xlu1 %1652 }
 0x23d   : > { %v1742_v32 = vmul.f32 %v1653_v29, %v4316_v37 }
 0x23f   : > { %3255 = vmatmul.mubr.f32.gmra.mxu0 %v1742_v32 }
 0x240   : > { %v1658_v52 = vpop.permute.xlu0 %1657 }
 0x241   : > { %v1743_v9 = vmul.f32 %v1658_v52, %v4320_v51 }
 0x243   : > { %3257 = vmatprep.mubr.f32.mxu0 %v1743_v9 }
 0x244   : > { %v1663_v2 = vpop.permute.xlu1 %1662 }
 0x245   : > { %v1744_v58 = vmul.f32 %v1663_v2, %v4324_v10 }
 0x247   : > { %3258 = vmatmul.mubr.f32.gmra.mxu0 %v1744_v58 }
 0x248   : > { %v1668_v63 = vpop.permute.xlu0 %1667 }
 0x249   : > { %v1745_v12 = vmul.f32 %v1668_v63, %v4327_v21 }
 0x24b   : > { %3260 = vmatprep.mubr.f32.mxu0 %v1745_v12 }
 0x24c   : > { %v1673_v59 = vpop.permute.xlu1 %1672 }
 0x24d   : > { %v1746_v22 = vmul.f32 %v1673_v59, %v4331_v34 }
 0x24f   : > { %3261 = vmatmul.mubr.f32.gmra.mxu0 %v1746_v22 }
 0x250   : > { %v1678_v20 = vpop.permute.xlu0 %1677 }
 0x251   : > { %v1747_v37 = vmul.f32 %v1678_v20, %v4334_v55 }
 0x253   : > { %3263 = vmatprep.mubr.f32.mxu0 %v1747_v37 }
 0x254   : > { %v1683_v44 = vpop.permute.xlu1 %1682 }
 0x255   : > { %v1748_v51 = vmul.f32 %v1683_v44, %v4338_v18 }
 0x257   : > { %3264 = vmatmul.mubr.f32.gmra.mxu0 %v1748_v51 }
 0x258   : > { %v1688_v1 = vpop.permute.xlu0 %1687 }
 0x259   : > { %v1749_v10 = vmul.f32 %v1688_v1, %v4342_v39 }
 0x25b   : > { %3266 = vmatprep.mubr.f32.mxu0 %v1749_v10 }
 0x25c   : > { %v1693_v46 = vpop.permute.xlu1 %1692 }
 0x25d   : > { %v1750_v21 = vmul.f32 %v1693_v46, %v4347_v31 }
 0x25f   : > { %3267 = vmatmul.mubr.f32.gmra.mxu0 %v1750_v21 }
 0x260   : > { %v1698_v38 = vpop.permute.xlu0 %1697 }
 0x261   : > { %v1751_v34 = vmul.f32 %v1698_v38, %v4351_v40 }
 0x263   : > { %3269 = vmatprep.mubr.f32.mxu0 %v1751_v34 }
 0x264   : > { %v1703_v56 = vpop.permute.xlu1 %1702 }
 0x265   : > { %v1752_v55 = vmul.f32 %v1703_v56, %v4356_v61  ;;  %v4411_v61 = vld [vmem:[%s4751_s4] ss:$0 sm:$0xff] }
 0x267   : > { %3270 = vmatmul.mubr.f32.gmra.mxu0 %v1752_v55 }
 0x268   : > { %v1708_v47 = vpop.permute.xlu0 %1707 }
 0x269   : > { %v1753_v18 = vmul.f32 %v1708_v47, %v4360_v28 }
 0x26b   : > { %3272 = vmatprep.mubr.f32.mxu0 %v1753_v18 }
 0x26c   : > { %v1713_v24 = vpop.permute.xlu1 %1712 }
 0x26d   : > { %v1754_v39 = vmul.f32 %v1713_v24, %v4365_v50 }
 0x26f   : > { %3273 = vmatmul.mubr.f32.gmra.mxu0 %v1754_v39 }
 0x270   : > { %v1718_v8 = vpop.permute.xlu0 %1717 }
 0x271   : > { %v1755_v31 = vmul.f32 %v1718_v8, %v4369_v35 }
 0x273   : > { %3275 = vmatprep.mubr.f32.mxu0 %v1755_v31 }
 0x274   : > { %v1723_v19 = vpop.permute.xlu1 %1722 }
 0x275   : > { %v1756_v40 = vmul.f32 %v1723_v19, %v4373_v33 }
 0x277   : > { %3276 = vmatmul.mubr.f32.gmra.mxu0 %v1756_v40 }
 0x2bf   : > { %v3232_v0 = vpop.f32.mrf.mxu0 }
 0x2c0   : > { %v1852_v28 = vadd.f32 %v3232_v0, %v4411_v61 }
 0x2c1   : > { %v1846_v43 = vpop.f32.mrf.mxu0 }
 0x2c2   : > { %v4414_v3 = vmax.f32 %v1852_v28, 0.0  ;;  %v1847_v50 = vadd.f32 %v4411_v61, %v1846_v43 }
 0x2c4   : > { %v4417_v4 = vmax.f32 %v1847_v50, 0.0  ;;  %v2038_v35 = vmul.f32 %v4414_v3, %v4414_v3 }
 0x2c6   : > { %2071 = vadd.xlane.f32.xlu1 %v2038_v35  ;;  %v2037_v33 = vmul.f32 %v4417_v4, %v4417_v4 }
 0x2c7   : > { %v3235_v15 = vpop.f32.mrf.mxu0 }
 0x2c8   : > { %v1862_v30 = vadd.f32 %v3235_v15, %v4411_v61  ;;  %2069 = vadd.xlane.f32.xlu0 %v2037_v33 }
 0x2c9   : > { %v1856_v27 = vpop.f32.mrf.mxu0 }
 0x2ca   : > { %v4424_v42 = vmax.f32 %v1862_v30, 0.0  ;;  %v1857_v41 = vadd.f32 %v4411_v61, %v1856_v27 }
 0x2cc   : > { %v4427_v13 = vmax.f32 %v1857_v41, 0.0  ;;  %v2040_v57 = vmul.f32 %v4424_v42, %v4424_v42 }
 0x2ce   : > { %2075 = vadd.xlane.f32.xlu0 %v2040_v57  ;;  %v2039_v16 = vmul.f32 %v4427_v13, %v4427_v13 }
 0x2cf   : > { %v3238_v48 = vpop.f32.mrf.mxu0 }
 0x2d0   : > { %v1872_v11 = vadd.f32 %v3238_v48, %v4411_v61 }
 0x2d1   : > { %v1866_v23 = vpop.f32.mrf.mxu0 }
 0x2d2   : > { %v4434_v17 = vmax.f32 %v1872_v11, 0.0  ;;  %v1867_v36 = vadd.f32 %v4411_v61, %v1866_v23  ;;  %2073 = vadd.xlane.f32.xlu0 %v2039_v16 }
 0x2d4   : > { %v4437_v60 = vmax.f32 %v1867_v36, 0.0  ;;  %v2042_v49 = vmul.f32 %v4434_v17, %v4434_v17 }
 0x2d6   : > { %2079 = vadd.xlane.f32.xlu0 %v2042_v49  ;;  %v2041_v45 = vmul.f32 %v4437_v60, %v4437_v60 }
 0x2d7   : > { %v3241_v54 = vpop.f32.mrf.mxu0 }
 0x2d8   : > { %v1882_v7 = vadd.f32 %v3241_v54, %v4411_v61  ;;  %2077 = vadd.xlane.f32.xlu1 %v2041_v45 }
 0x2d9   : > { %v1876_v62 = vpop.f32.mrf.mxu0 }
 0x2da   : > { %v4444_v25 = vmax.f32 %v1882_v7, 0.0  ;;  %v1877_v5 = vadd.f32 %v4411_v61, %v1876_v62 }
 0x2dc   : > { %v4447_v53 = vmax.f32 %v1877_v5, 0.0  ;;  %v2044_v14 = vmul.f32 %v4444_v25, %v4444_v25 }
 0x2de   : > { %2083 = vadd.xlane.f32.xlu0 %v2044_v14  ;;  %v2043_v26 = vmul.f32 %v4447_v53, %v4447_v53 }
 0x2df   : > { %v3244_v6 = vpop.f32.mrf.mxu0 }
 0x2e0   : > { %v1892_v29 = vadd.f32 %v3244_v6, %v4411_v61  ;;  %2081 = vadd.xlane.f32.xlu1 %v2043_v26 }
 0x2e1   : > { %v1886_v32 = vpop.f32.mrf.mxu0 }
 0x2e2   : > { %v4454_v52 = vmax.f32 %v1892_v29, 0.0  ;;  %v1887_v9 = vadd.f32 %v4411_v61, %v1886_v32 }
 0x2e4   : > { %v4457_v2 = vmax.f32 %v1887_v9, 0.0  ;;  %v2046_v58 = vmul.f32 %v4454_v52, %v4454_v52 }
 0x2e6   : > { %2087 = vadd.xlane.f32.xlu0 %v2046_v58  ;;  %v2045_v63 = vmul.f32 %v4457_v2, %v4457_v2 }
 0x2e7   : > { %v3247_v12 = vpop.f32.mrf.mxu0 }
 0x2e8   : > { %v1902_v59 = vadd.f32 %v3247_v12, %v4411_v61  ;;  %2085 = vadd.xlane.f32.xlu1 %v2045_v63 }
 0x2e9   : > { %v1896_v22 = vpop.f32.mrf.mxu0 }
 0x2ea   : > { %v4464_v20 = vmax.f32 %v1902_v59, 0.0  ;;  %v1897_v37 = vadd.f32 %v4411_v61, %v1896_v22 }
 0x2ec   : > { %v4467_v44 = vmax.f32 %v1897_v37, 0.0  ;;  %v2048_v51 = vmul.f32 %v4464_v20, %v4464_v20 }
 0x2ee   : > { %2091 = vadd.xlane.f32.xlu0 %v2048_v51  ;;  %v2047_v1 = vmul.f32 %v4467_v44, %v4467_v44 }
 0x2ef   : > { %v3250_v10 = vpop.f32.mrf.mxu0 }
 0x2f0   : > { %v1912_v46 = vadd.f32 %v3250_v10, %v4411_v61  ;;  %2089 = vadd.xlane.f32.xlu1 %v2047_v1 }
 0x2f1   : > { %v1906_v21 = vpop.f32.mrf.mxu0 }
 0x2f2   : > { %v4474_v38 = vmax.f32 %v1912_v46, 0.0  ;;  %v1907_v34 = vadd.f32 %v4411_v61, %v1906_v21 }
 0x2f4   : > { %v4477_v56 = vmax.f32 %v1907_v34, 0.0  ;;  %v2050_v55 = vmul.f32 %v4474_v38, %v4474_v38 }
 0x2f6   : > { %2095 = vadd.xlane.f32.xlu0 %v2050_v55  ;;  %v2049_v47 = vmul.f32 %v4477_v56, %v4477_v56 }
 0x2f7   : > { %v3253_v18 = vpop.f32.mrf.mxu0 }
 0x2f8   : > { %v1922_v24 = vadd.f32 %v3253_v18, %v4411_v61  ;;  %2093 = vadd.xlane.f32.xlu1 %v2049_v47 }
 0x2f9   : > { %v1916_v39 = vpop.f32.mrf.mxu0 }
 0x2fa   : > { %v4484_v8 = vmax.f32 %v1922_v24, 0.0  ;;  %v1917_v31 = vadd.f32 %v4411_v61, %v1916_v39 }
 0x2fc   : > { %v4487_v19 = vmax.f32 %v1917_v31, 0.0  ;;  %v2052_v40 = vmul.f32 %v4484_v8, %v4484_v8 }
 0x2fe   : > { %2099 = vadd.xlane.f32.xlu0 %v2052_v40  ;;  %v2051_v0 = vmul.f32 %v4487_v19, %v4487_v19 }
 0x2ff   : > { %v3256_v28 = vpop.f32.mrf.mxu0 }
 0x300   : > { %v1932_v43 = vadd.f32 %v3256_v28, %v4411_v61  ;;  %2097 = vadd.xlane.f32.xlu1 %v2051_v0 }
 0x301   : > { %v1926_v50 = vpop.f32.mrf.mxu0 }
 0x302   : > { %v4494_v35 = vmax.f32 %v1932_v43, 0.0  ;;  %v1927_v33 = vadd.f32 %v4411_v61, %v1926_v50 }
 0x304   : > { %v4497_v15 = vmax.f32 %v1927_v33, 0.0  ;;  %v2054_v30 = vmul.f32 %v4494_v35, %v4494_v35 }
 0x306   : > { %2103 = vadd.xlane.f32.xlu0 %v2054_v30  ;;  %v2053_v27 = vmul.f32 %v4497_v15, %v4497_v15 }
 0x307   : > { %v3259_v41 = vpop.f32.mrf.mxu0 }
 0x308   : > { %v1942_v57 = vadd.f32 %v3259_v41, %v4411_v61  ;;  %2101 = vadd.xlane.f32.xlu1 %v2053_v27 }
 0x309   : > { %v1936_v48 = vpop.f32.mrf.mxu0 }
 0x30a   : > { %v4504_v11 = vmax.f32 %v1942_v57, 0.0  ;;  %v1937_v16 = vadd.f32 %v4411_v61, %v1936_v48 }
 0x30c   : > { %v4507_v23 = vmax.f32 %v1937_v16, 0.0  ;;  %v2056_v36 = vmul.f32 %v4504_v11, %v4504_v11 }
 0x30e   : > { %2107 = vadd.xlane.f32.xlu0 %v2056_v36  ;;  %v2055_v49 = vmul.f32 %v4507_v23, %v4507_v23 }
 0x30f   : > { %v3262_v45 = vpop.f32.mrf.mxu0 }
 0x310   : > { %v1952_v54 = vadd.f32 %v3262_v45, %v4411_v61  ;;  %2105 = vadd.xlane.f32.xlu1 %v2055_v49 }
 0x311   : > { %v1946_v7 = vpop.f32.mrf.mxu0 }
 0x312   : > { %v4514_v62 = vmax.f32 %v1952_v54, 0.0  ;;  %v1947_v5 = vadd.f32 %v4411_v61, %v1946_v7 }
 0x314   : > { %v4517_v14 = vmax.f32 %v1947_v5, 0.0  ;;  %v2058_v26 = vmul.f32 %v4514_v62, %v4514_v62 }
 0x316   : > { %2111 = vadd.xlane.f32.xlu0 %v2058_v26  ;;  %v2057_v6 = vmul.f32 %v4517_v14, %v4517_v14 }
 0x317   : > { %v3265_v29 = vpop.f32.mrf.mxu0 }
 0x318   : > { %v1962_v32 = vadd.f32 %v3265_v29, %v4411_v61  ;;  %2109 = vadd.xlane.f32.xlu1 %v2057_v6 }
 0x319   : > { %v1956_v9 = vpop.f32.mrf.mxu0 }
 0x31a   : > { %v4524_v58 = vmax.f32 %v1962_v32, 0.0  ;;  %v1957_v63 = vadd.f32 %v4411_v61, %v1956_v9 }
 0x31c   : > { %v4527_v12 = vmax.f32 %v1957_v63, 0.0  ;;  %v2060_v59 = vmul.f32 %v4524_v58, %v4524_v58 }
 0x31e   : > { %2115 = vadd.xlane.f32.xlu0 %v2060_v59  ;;  %v2059_v22 = vmul.f32 %v4527_v12, %v4527_v12 }
 0x31f   : > { %v3268_v37 = vpop.f32.mrf.mxu0 }
 0x320   : > { %v1972_v51 = vadd.f32 %v3268_v37, %v4411_v61  ;;  %2113 = vadd.xlane.f32.xlu1 %v2059_v22  ;;  %v2229_v22 = vlaneseq }
 0x321   : > { %v1966_v1 = vpop.f32.mrf.mxu0 }
 0x322   : > { %v4534_v10 = vmax.f32 %v1972_v51, 0.0  ;;  %v1967_v46 = vadd.f32 %v4411_v61, %v1966_v1  ;;  %v4573_v51 = vand.u32 127, %v2229_v22 }
 0x324   : > { %v4537_v21 = vmax.f32 %v1967_v46, 0.0  ;;  %v2062_v34 = vmul.f32 %v4534_v10, %v4534_v10  ;;  %vm2231_vm0 = vcmp.eq.s32.totalorder %v4573_v51, 32 }
 0x326   : > { %2119 = vadd.xlane.f32.xlu0 %v2062_v34  ;;  %v2061_v55 = vmul.f32 %v4537_v21, %v4537_v21 }
 0x327   : > { %v3271_v47 = vpop.f32.mrf.mxu0 }
 0x328   : > { %v1982_v18 = vadd.f32 %v3271_v47, %v4411_v61  ;;  %2117 = vadd.xlane.f32.xlu1 %v2061_v55 }
 0x329   : > { %v1976_v24 = vpop.f32.mrf.mxu0 }
 0x32a   : > { %v4544_v39 = vmax.f32 %v1982_v18, 0.0  ;;  %v1977_v31 = vadd.f32 %v4411_v61, %v1976_v24 }
 0x32c   : > { %v4547_v40 = vmax.f32 %v1977_v31, 0.0  ;;  %v2064_v0 = vmul.f32 %v4544_v39, %v4544_v39 }
 0x32e   : > { %2123 = vadd.xlane.f32.xlu0 %v2064_v0  ;;  %v2063_v28 = vmul.f32 %v4547_v40, %v4547_v40 }
 0x32f   : > { %v3274_v43 = vpop.f32.mrf.mxu0 }
 0x330   : > { %v1992_v50 = vadd.f32 %v3274_v43, %v4411_v61  ;;  %2121 = vadd.xlane.f32.xlu1 %v2063_v28 }
 0x331   : > { %v1986_v33 = vpop.f32.mrf.mxu0 }
 0x332   : > { %v4554_v30 = vmax.f32 %v1992_v50, 0.0  ;;  %v1987_v27 = vadd.f32 %v4411_v61, %v1986_v33 }
 0x334   : > { %v4557_v41 = vmax.f32 %v1987_v27, 0.0  ;;  %v2066_v57 = vmul.f32 %v4554_v30, %v4554_v30 }
 0x336   : > { %2127 = vadd.xlane.f32.xlu0 %v2066_v57  ;;  %v2065_v48 = vmul.f32 %v4557_v41, %v4557_v41 }
 0x337   : > { %v3277_v16 = vpop.f32.mrf.mxu0 }
 0x338   : > { %v2002_v36 = vadd.f32 %v3277_v16, %v4411_v61  ;;  %2125 = vadd.xlane.f32.xlu1 %v2065_v48 }
 0x339   : > { %v1996_v49 = vpop.f32.mrf.mxu0 }
 0x33a   : > { %v4564_v45 = vmax.f32 %v2002_v36, 0.0  ;;  %v1997_v54 = vadd.f32 %v4411_v61, %v1996_v49 }
 0x33c   : > { %v4567_v7 = vmax.f32 %v1997_v54, 0.0  ;;  %v2068_v5 = vmul.f32 %v4564_v45, %v4564_v45 }
 0x33e   : > { %2131 = vadd.xlane.f32.xlu0 %v2068_v5  ;;  %v2067_v26 = vmul.f32 %v4567_v7, %v4567_v7 }
 0x340   : > { %2129 = vadd.xlane.f32.xlu1 %v2067_v26 }
 0x34f   : > { %v2072_v6 = vpop.xlane.xlu1 %2071 }
 0x350   : > { %v2134_v29 = vmax.f32 %v2072_v6, 1e-24 }
 0x351   : > { %v2070_v32 = vpop.xlane.xlu0 %2069 }
 0x352   : > { %3585 = vrsqrt.f32 %v2134_v29  ;;  %v2133_v9 = vmax.f32 %v2070_v32, 1e-24 }
 0x354   : > { %3587 = vrsqrt.f32 %v2133_v9 }
 0x357   : > { %v2076_v63 = vpop.xlane.xlu0 %2075 }
 0x358   : > { %v2136_v59 = vmax.f32 %v2076_v63, 1e-24 }
 0x35a   : > { %3589 = vrsqrt.f32 %v2136_v59 }
 0x35b   : > { %v2074_v61 = vpop.xlane.xlu0 %2073 }
 0x35c   : > { %v2135_v37 = vmax.f32 %v2074_v61, 1e-24 }
 0x35e   : > { %3591 = vrsqrt.f32 %v2135_v37 }
 0x35f   : > { %v3586_v1 = vpop.eup %3585  ;;  %v2080_v46 = vpop.xlane.xlu0 %2079 }
 0x360   : > { %v2198_v34 = vmul.f32 %v3586_v1, %v4414_v3  ;;  %v2138_v55 = vmax.f32 %v2080_v46, 1e-24 }
 0x361   : > { %v3588_v47 = vpop.eup %3587  ;;  %v2078_v18 = vpop.xlane.xlu1 %2077 }
 0x362   : > { %v2197_v24 = vmul.f32 %v3588_v47, %v4417_v4  ;;  %3593 = vrsqrt.f32 %v2138_v55  ;;  %v2137_v31 = vmax.f32 %v2078_v18, 1e-24  ;;  %v2233_v0 = vsel %vm2231_vm0, 1.0, %v2198_v34 }
 0x364   : > { %v2232_v28 = vsel %vm2231_vm0, 1.0, %v2197_v24  ;;  %3595 = vrsqrt.f32 %v2137_v31 }
 0x365   : > { %v2819_v43 = vpack.c.bf16 %v2233_v0, %v2232_v28 }
 0x367   : > { %v3590_v50 = vpop.eup %3589  ;;  %2820 = vst [vmem:[%s4584_s7] sm:$0xff] %v2819_v43   ;;  %v2084_v3 = vpop.xlane.xlu0 %2083 }
 0x368   : > { %v2140_v33 = vmax.f32 %v2084_v3, 1e-24  ;;  %v2200_v27 = vmul.f32 %v3590_v50, %v4424_v42 }
 0x369   : > { %v2082_v4 = vpop.xlane.xlu1 %2081 }
 0x36a   : > { %3597 = vrsqrt.f32 %v2140_v33  ;;  %v2139_v57 = vmax.f32 %v2082_v4, 1e-24  ;;  %v2235_v36 = vsel %vm2231_vm0, 1.0, %v2200_v27 }
 0x36b   : > { %v3592_v48 = vpop.eup %3591 }
 0x36c   : > { %v2199_v16 = vmul.f32 %v3592_v48, %v4427_v13  ;;  %3599 = vrsqrt.f32 %v2139_v57 }
 0x36e   : > { %v2234_v49 = vsel %vm2231_vm0, 1.0, %v2199_v16 }
 0x36f   : > { %v3594_v54 = vpop.eup %3593  ;;  %v2824_v5 = vpack.c.bf16 %v2235_v36, %v2234_v49  ;;  %v2088_v26 = vpop.xlane.xlu0 %2087 }
 0x370   : > { %v2202_v6 = vmul.f32 %v3594_v54, %v4434_v17  ;;  %v2142_v29 = vmax.f32 %v2088_v26, 1e-24 }
 0x371   : > { %v3596_v42 = vpop.eup %3595  ;;  %2911 = vst [vmem:[%s4584_s7 + $0x8] sm:$0xff] %v2824_v5   ;;  %v2086_v32 = vpop.xlane.xlu1 %2085 }
 0x372   : > { %v2201_v9 = vmul.f32 %v3596_v42, %v4437_v60  ;;  %3601 = vrsqrt.f32 %v2142_v29  ;;  %v2141_v13 = vmax.f32 %v2086_v32, 1e-24  ;;  %v2237_v63 = vsel %vm2231_vm0, 1.0, %v2202_v6 }
 0x374   : > { %v2236_v59 = vsel %vm2231_vm0, 1.0, %v2201_v9  ;;  %3603 = vrsqrt.f32 %v2141_v13 }
 0x375   : > { %v2829_v22 = vpack.c.bf16 %v2237_v63, %v2236_v59 }
 0x377   : > { %v3598_v61 = vpop.eup %3597  ;;  %2912 = vst [vmem:[%s4584_s7 + $0x10] sm:$0xff] %v2829_v22   ;;  %v2092_v17 = vpop.xlane.xlu0 %2091 }
 0x378   : > { %v2204_v37 = vmul.f32 %v3598_v61, %v4444_v25  ;;  %v2144_v1 = vmax.f32 %v2092_v17, 1e-24 }
 0x379   : > { %v3600_v46 = vpop.eup %3599  ;;  %v2090_v34 = vpop.xlane.xlu1 %2089 }
 0x37a   : > { %v2203_v60 = vmul.f32 %v3600_v46, %v4447_v53  ;;  %3605 = vrsqrt.f32 %v2144_v1  ;;  %v2143_v55 = vmax.f32 %v2090_v34, 1e-24  ;;  %v2239_v47 = vsel %vm2231_vm0, 1.0, %v2204_v37 }
 0x37c   : > { %v2238_v18 = vsel %vm2231_vm0, 1.0, %v2203_v60  ;;  %3607 = vrsqrt.f32 %v2143_v55 }
 0x37d   : > { %v2834_v24 = vpack.c.bf16 %v2239_v47, %v2238_v18 }
 0x37f   : > { %v3602_v31 = vpop.eup %3601  ;;  %2913 = vst [vmem:[%s4584_s7 + $0x18] sm:$0xff] %v2834_v24   ;;  %v2096_v0 = vpop.xlane.xlu0 %2095 }
 0x380   : > { %v2206_v25 = vmul.f32 %v3602_v31, %v4454_v52  ;;  %v2146_v28 = vmax.f32 %v2096_v0, 1e-24 }
 0x381   : > { %v3604_v43 = vpop.eup %3603  ;;  %v2094_v50 = vpop.xlane.xlu1 %2093 }
 0x382   : > { %v2205_v53 = vmul.f32 %v3604_v43, %v4457_v2  ;;  %3609 = vrsqrt.f32 %v2146_v28  ;;  %v2145_v3 = vmax.f32 %v2094_v50, 1e-24  ;;  %v2241_v33 = vsel %vm2231_vm0, 1.0, %v2206_v25 }
 0x384   : > { %v2240_v4 = vsel %vm2231_vm0, 1.0, %v2205_v53  ;;  %3611 = vrsqrt.f32 %v2145_v3 }
 0x385   : > { %v2839_v27 = vpack.c.bf16 %v2241_v33, %v2240_v4 }
 0x387   : > { %v3606_v57 = vpop.eup %3605  ;;  %2914 = vst [vmem:[%s4584_s7 + $0x20] sm:$0xff] %v2839_v27   ;;  %v2100_v48 = vpop.xlane.xlu0 %2099 }
 0x388   : > { %v2208_v52 = vmul.f32 %v3606_v57, %v4464_v20  ;;  %v2148_v16 = vmax.f32 %v2100_v48, 1e-24 }
 0x389   : > { %v3608_v36 = vpop.eup %3607  ;;  %v2098_v49 = vpop.xlane.xlu1 %2097 }
 0x38a   : > { %v2207_v2 = vmul.f32 %v3608_v36, %v4467_v44  ;;  %3613 = vrsqrt.f32 %v2148_v16  ;;  %v2147_v54 = vmax.f32 %v2098_v49, 1e-24  ;;  %v2243_v5 = vsel %vm2231_vm0, 1.0, %v2208_v52 }
 0x38c   : > { %v2242_v26 = vsel %vm2231_vm0, 1.0, %v2207_v2  ;;  %3615 = vrsqrt.f32 %v2147_v54 }
 0x38d   : > { %v2844_v6 = vpack.c.bf16 %v2243_v5, %v2242_v26 }
 0x38f   : > { %v3610_v29 = vpop.eup %3609  ;;  %2915 = vst [vmem:[%s4584_s7 + $0x28] sm:$0xff] %v2844_v6   ;;  %v2104_v42 = vpop.xlane.xlu0 %2103 }
 0x390   : > { %v2210_v20 = vmul.f32 %v3610_v29, %v4474_v38  ;;  %v2150_v32 = vmax.f32 %v2104_v42, 1e-24 }
 0x391   : > { %v3612_v9 = vpop.eup %3611  ;;  %v2102_v13 = vpop.xlane.xlu1 %2101 }
 0x392   : > { %v2209_v44 = vmul.f32 %v3612_v9, %v4477_v56  ;;  %3617 = vrsqrt.f32 %v2150_v32  ;;  %v2149_v63 = vmax.f32 %v2102_v13, 1e-24  ;;  %v2245_v59 = vsel %vm2231_vm0, 1.0, %v2210_v20 }
 0x394   : > { %v2244_v22 = vsel %vm2231_vm0, 1.0, %v2209_v44  ;;  %3619 = vrsqrt.f32 %v2149_v63 }
 0x395   : > { %v2849_v61 = vpack.c.bf16 %v2245_v59, %v2244_v22 }
 0x397   : > { %v3614_v17 = vpop.eup %3613  ;;  %2916 = vst [vmem:[%s4584_s7 + $0x30] sm:$0xff] %v2849_v61   ;;  %v2108_v37 = vpop.xlane.xlu0 %2107 }
 0x398   : > { %v2212_v38 = vmul.f32 %v3614_v17, %v4484_v8  ;;  %v2152_v1 = vmax.f32 %v2108_v37, 1e-24 }
 0x399   : > { %v3616_v46 = vpop.eup %3615  ;;  %v2106_v34 = vpop.xlane.xlu1 %2105 }
 0x39a   : > { %v2211_v56 = vmul.f32 %v3616_v46, %v4487_v19  ;;  %3621 = vrsqrt.f32 %v2152_v1  ;;  %v2151_v60 = vmax.f32 %v2106_v34, 1e-24  ;;  %v2247_v55 = vsel %vm2231_vm0, 1.0, %v2212_v38 }
 0x39c   : > { %v2246_v47 = vsel %vm2231_vm0, 1.0, %v2211_v56  ;;  %3623 = vrsqrt.f32 %v2151_v60 }
 0x39d   : > { %v2854_v18 = vpack.c.bf16 %v2247_v55, %v2246_v47 }
 0x39f   : > { %v3618_v24 = vpop.eup %3617  ;;  %2917 = vst [vmem:[%s4584_s7 + $0x38] sm:$0xff] %v2854_v18   ;;  %v2112_v31 = vpop.xlane.xlu0 %2111 }
 0x3a0   : > { %v2214_v8 = vmul.f32 %v3618_v24, %v4494_v35  ;;  %v2154_v0 = vmax.f32 %v2112_v31, 1e-24 }
 0x3a1   : > { %v3620_v25 = vpop.eup %3619  ;;  %v2110_v28 = vpop.xlane.xlu1 %2109 }
 0x3a2   : > { %v2213_v19 = vmul.f32 %v3620_v25, %v4497_v15  ;;  %3625 = vrsqrt.f32 %v2154_v0  ;;  %v2153_v43 = vmax.f32 %v2110_v28, 1e-24  ;;  %v2249_v50 = vsel %vm2231_vm0, 1.0, %v2214_v8 }
 0x3a4   : > { %v2248_v53 = vsel %vm2231_vm0, 1.0, %v2213_v19  ;;  %3627 = vrsqrt.f32 %v2153_v43 }
 0x3a5   : > { %v2859_v3 = vpack.c.bf16 %v2249_v50, %v2248_v53 }
 0x3a7   : > { %v3622_v33 = vpop.eup %3621  ;;  %2918 = vst [vmem:[%s4584_s7 + $0x40] sm:$0xff] %v2859_v3   ;;  %v2116_v4 = vpop.xlane.xlu0 %2115 }
 0x3a8   : > { %v2216_v35 = vmul.f32 %v3622_v33, %v4504_v11  ;;  %v2156_v27 = vmax.f32 %v2116_v4, 1e-24 }
 0x3a9   : > { %v3624_v57 = vpop.eup %3623  ;;  %v2114_v48 = vpop.xlane.xlu1 %2113 }
 0x3aa   : > { %v2215_v15 = vmul.f32 %v3624_v57, %v4507_v23  ;;  %3629 = vrsqrt.f32 %v2156_v27  ;;  %v2155_v52 = vmax.f32 %v2114_v48, 1e-24  ;;  %v2251_v16 = vsel %vm2231_vm0, 1.0, %v2216_v35 }
 0x3ac   : > { %v2250_v36 = vsel %vm2231_vm0, 1.0, %v2215_v15  ;;  %3631 = vrsqrt.f32 %v2155_v52 }
 0x3ad   : > { %v2864_v49 = vpack.c.bf16 %v2251_v16, %v2250_v36 }
 0x3af   : > { %v3626_v2 = vpop.eup %3625  ;;  %2919 = vst [vmem:[%s4584_s7 + $0x48] sm:$0xff] %v2864_v49   ;;  %v2120_v54 = vpop.xlane.xlu0 %2119 }
 0x3b0   : > { %v2218_v11 = vmul.f32 %v3626_v2, %v4514_v62  ;;  %v2158_v5 = vmax.f32 %v2120_v54, 1e-24 }
 0x3b1   : > { %v3628_v26 = vpop.eup %3627  ;;  %v2118_v6 = vpop.xlane.xlu1 %2117 }
 0x3b2   : > { %v2217_v23 = vmul.f32 %v3628_v26, %v4517_v14  ;;  %3633 = vrsqrt.f32 %v2158_v5  ;;  %v2157_v29 = vmax.f32 %v2118_v6, 1e-24  ;;  %v2253_v42 = vsel %vm2231_vm0, 1.0, %v2218_v11 }
 0x3b4   : > { %v2252_v20 = vsel %vm2231_vm0, 1.0, %v2217_v23  ;;  %3635 = vrsqrt.f32 %v2157_v29 }
 0x3b5   : > { %v2869_v32 = vpack.c.bf16 %v2253_v42, %v2252_v20 }
 0x3b7   : > { %v3630_v9 = vpop.eup %3629  ;;  %2920 = vst [vmem:[%s4584_s7 + $0x50] sm:$0xff] %v2869_v32   ;;  %v2124_v13 = vpop.xlane.xlu0 %2123 }
 0x3b8   : > { %v2220_v62 = vmul.f32 %v3630_v9, %v4524_v58  ;;  %v2160_v44 = vmax.f32 %v2124_v13, 1e-24 }
 0x3b9   : > { %v3632_v63 = vpop.eup %3631  ;;  %v2122_v59 = vpop.xlane.xlu1 %2121 }
 0x3ba   : > { %v2219_v14 = vmul.f32 %v3632_v63, %v4527_v12  ;;  %3637 = vrsqrt.f32 %v2160_v44  ;;  %v2159_v22 = vmax.f32 %v2122_v59, 1e-24  ;;  %v2255_v61 = vsel %vm2231_vm0, 1.0, %v2220_v62 }
 0x3bc   : > { %v2254_v17 = vsel %vm2231_vm0, 1.0, %v2219_v14  ;;  %3639 = vrsqrt.f32 %v2159_v22 }
 0x3bd   : > { %v2874_v37 = vpack.c.bf16 %v2255_v61, %v2254_v17 }
 0x3bf   : > { %v3634_v38 = vpop.eup %3633  ;;  %2921 = vst [vmem:[%s4584_s7 + $0x58] sm:$0xff] %v2874_v37   ;;  %v2128_v1 = vpop.xlane.xlu0 %2127 }
 0x3c0   : > { %v2222_v58 = vmul.f32 %v3634_v38, %v4534_v10  ;;  %v2162_v46 = vmax.f32 %v2128_v1, 1e-24 }
 0x3c1   : > { %v3636_v34 = vpop.eup %3635  ;;  %v2126_v56 = vpop.xlane.xlu1 %2125 }
 0x3c2   : > { %v2221_v12 = vmul.f32 %v3636_v34, %v4537_v21  ;;  %3641 = vrsqrt.f32 %v2162_v46  ;;  %v2161_v60 = vmax.f32 %v2126_v56, 1e-24  ;;  %v2257_v55 = vsel %vm2231_vm0, 1.0, %v2222_v58 }
 0x3c4   : > { %v2256_v47 = vsel %vm2231_vm0, 1.0, %v2221_v12  ;;  %3643 = vrsqrt.f32 %v2161_v60 }
 0x3c5   : > { %v2879_v18 = vpack.c.bf16 %v2257_v55, %v2256_v47 }
 0x3c7   : > { %v3638_v24 = vpop.eup %3637  ;;  %2922 = vst [vmem:[%s4584_s7 + $0x60] sm:$0xff] %v2879_v18   ;;  %v2132_v31 = vpop.xlane.xlu0 %2131 }
 0x3c8   : > { %v2224_v10 = vmul.f32 %v3638_v24, %v4544_v39  ;;  %v2164_v8 = vmax.f32 %v2132_v31, 1e-24 }
 0x3c9   : > { %v3640_v0 = vpop.eup %3639  ;;  %v2130_v25 = vpop.xlane.xlu1 %2129 }
 0x3ca   : > { %v2223_v21 = vmul.f32 %v3640_v0, %v4547_v40  ;;  %3645 = vrsqrt.f32 %v2164_v8  ;;  %v2163_v28 = vmax.f32 %v2130_v25, 1e-24  ;;  %v2259_v19 = vsel %vm2231_vm0, 1.0, %v2224_v10 }
 0x3cc   : > { %v2258_v43 = vsel %vm2231_vm0, 1.0, %v2223_v21  ;;  %3647 = vrsqrt.f32 %v2163_v28 }
 0x3cd   : > { %v2884_v50 = vpack.c.bf16 %v2259_v19, %v2258_v43 }
 0x3cf   : > { %v3642_v53 = vpop.eup %3641  ;;  %2923 = vst [vmem:[%s4584_s7 + $0x68] sm:$0xff] %v2884_v50  }
 0x3d0   : > { %v2226_v39 = vmul.f32 %v3642_v53, %v4554_v30 }
 0x3d1   : > { %v3644_v3 = vpop.eup %3643 }
 0x3d2   : > { %v2225_v40 = vmul.f32 %v3644_v3, %v4557_v41  ;;  %v2261_v33 = vsel %vm2231_vm0, 1.0, %v2226_v39 }
 0x3d4   : > { %v2260_v4 = vsel %vm2231_vm0, 1.0, %v2225_v40 }
 0x3d5   : > { %v2889_v35 = vpack.c.bf16 %v2261_v33, %v2260_v4 }
 0x3d7   : > { %v3646_v27 = vpop.eup %3645  ;;  %2924 = vst [vmem:[%s4584_s7 + $0x70] sm:$0xff] %v2889_v35  }
 0x3d8   : > { %v2228_v57 = vmul.f32 %v3646_v27, %v4564_v45 }
 0x3d9   : > { %v3648_v48 = vpop.eup %3647 }
 0x3da   : > { %v2227_v30 = vmul.f32 %v3648_v48, %v4567_v7  ;;  %v2263_v41 = vsel %vm2231_vm0, 1.0, %v2228_v57 }
 0x3dc   : > { %v2262_v15 = vsel %vm2231_vm0, 1.0, %v2227_v30 }
 0x3dd   : > { %v2894_v45 = vpack.c.bf16 %v2263_v41, %v2262_v15 }
 0x3df   : > { %2925 = vst [vmem:[%s4584_s7 + $0x78] sm:$0xff] %v2894_v45  }
 0x3e0   : > { %3770 = shalt.err (!%p3767_p13)
}
 0x3e1   : > { %s3771_s1 = scalar_lea.hbm %s4696_s30, 2048  ;;  %s3775_s8 = scalar_lea.hbm %s4752_s5, 4096 }
 0x3e2   : > { %p3772_p11 = scmp.ne.s32.totalorder %s4696_s30, %s3771_s1  ;;  %p3776_p5 = scmp.lt.s32.totalorder %s4696_s30, %s4752_s5 }
 0x3e3   : > { %p3777_p10 = scmp.lt.s32.totalorder %s3775_s8, %s3771_s1 }
 0x3e4   : > { %p3773_p2 = pnand %p3772_p11, %p3984_p3 }
 0x3e5   : > { %p3778_p4 = por %p3777_p10, %p3776_p5 }
 0x3e6   : > { %p3774_p8 = pneg %p3773_p2 }
 0x3e8   : > { %p3779_p9 = pnand %p3778_p4, %p3774_p8 }
 0x3ea   : > { %3782 = shalt.err (!%p3779_p9)
}
 0x3eb   : > { %s3863_s24 = smov 64   ;;  %s3864_s26 = smov 4  }
 0x3ec   : > { %3306 = dma.vmem_to_hbm [thread:$0]  (%p3984_p3), %s4698_s17, 2048, %s4696_s30, %s2425_s21, %s3863_s24, %s3863_s24, %s3864_s26  }
 0x3ed PF: > { %s2453_s16 = sand.u32 1, %s3829_s18   ;;  %p4783_p1 = scmp.ge.s32.totalorder %s3849_s23, 2 }
 0x3ee   : > { %s2454_s11 = scalar_lea.sflag [#allocation5], %s2453_s16 }
 0x3ef   : > { %p3323_p12 = pnand %p4783_p1, %p3940_p6 }
 0x3f1   : > { %p3324_p0 = pneg %p3323_p12 }
 0x3f3   : > { %3824 = dma.done.wait (%p3324_p0), %s2454_s11, 2048  }
 0x3f4   : > { %3826 = vsyncadd (%p3324_p0), %s2454_s11, 4294965248  ;;  %s22_s23 = sadd.s32 1, %s3849_s23   ;;  %s4784_s15 = sld [smem:[#allocation17_spill]] }
 0x3f5   : > { %p19_p7 = scmp.ge.s32.totalorder %s22_s23, 4   ;;  %s4785_s18 = smov %s3833_s19 }
 0x3f6   : > { %s4786_s19 = smov %s3837_s20  ;;  %s4787_s20 = smov %s3994_s29 }
 0x3f7   : > { %s4788_s21 = smov %s3845_s22  ;;  %21 = sbr.rel (!%p19_p7) target bundleno = 10 (0xa), region = 113 }
 0x3fa   : > { %s4789_s22 = smov %s4784_s15 }
 0x3fc   :  { %2459 = vsyncpa [#allocation4], 1 }
 0x3fd   :  { %2461 = vsyncpa [#allocation4 + $0x1], 1 }
 0x3fe   :  { %2462 = vsyncpa [#allocation7], 1 }
 0x3ff   :  { %2463 = vsyncpa [#allocation5], 1 }
 0x400   :  { %2465 = vsyncpa [#allocation5 + $0x1], 1 }

</bundles_post_ra>
